<compile_context>
chip_gen: v7x
topology: tpu7x:2x2x1
jax: 0.10.0
libtpu: 0.0.40
codegen_flags: <defaults>
</compile_context>

<pallas_src>
import functools

import jax
import jax.numpy as jnp
from jax.experimental import pallas as pl
from jax.experimental.pallas import tpu as pltpu

BN_EPS = 1e-5
LANES = 128          # TPU lane width: every channel axis is padded to this
_OFF = 8             # sublane offset of the image interior inside the padded
                     # VMEM scratch (multiple of 8 -> aligned stores)


# ---------------------------------------------------------------------------
# Fused Pallas kernel: one full down-block forward per grid step (one image)
# ---------------------------------------------------------------------------
def _down_block_kernel(x_ref, dw1w_ref, aff1_ref, pw1w_ref, aff2_ref,
                       dw2w_ref, aff3_ref, pw2w_ref, aff4_ref,
                       c3w_ref, aff5_ref, o_ref, pad_ref, *, H, W):
    C = LANES
    WP = W + 2 * _OFF
    f32 = jnp.float32

    def repack(v3d):
        """Write an (H, W, C) activation into the zero-padded scratch interior."""
        pad_ref[1:H + 1, _OFF:_OFF + W, :] = v3d

    def dw3x3_bn_relu6(w_ref, aff_ref):
        """Depthwise 3x3 (padding=1) + BN + ReLU6 over the scratch contents."""
        acc = jnp.zeros((H, W, C), f32)
        for kh in range(3):                       # statically unrolled VPU MACs
            for kw in range(3):
                tap = pad_ref[kh:kh + H, _OFF - 1 + kw:_OFF - 1 + kw + W, :]
                acc = acc + tap * w_ref[kh * 3 + kw]      # (1, C) broadcast
        y = acc * aff_ref[0] + aff_ref[1]
        return jnp.clip(y, 0.0, 6.0)

    def pw_bn_relu6(h, w_ref, aff_ref):
        """1x1 conv + BN + ReLU6; the output-channel offset is baked into w."""
        hm = h.reshape(H * W, C).astype(jnp.bfloat16)
        z = jnp.dot(hm, w_ref[...], preferred_element_type=f32)   # MXU
        z = z * aff_ref[0] + aff_ref[1]
        return jnp.clip(z, 0.0, 6.0)                              # (H*W, C)

    # Zero the padded scratch (borders = conv padding) and drop the input in.
    pad_ref[...] = jnp.zeros((H + 2, WP, C), f32)
    x = x_ref[...]                                                # (H, W, C)
    repack(x)

    # conv11 (depthwise) + conv12 (pointwise); x12 lands at lanes [Cin:Cin+Cout]
    h1 = dw3x3_bn_relu6(dw1w_ref, aff1_ref)
    z1 = pw_bn_relu6(h1, pw1w_ref, aff2_ref)
    x21 = x.reshape(H * W, C) + z1                                # == cat(x, x12)

    # conv21 + conv22; x22 lands at lanes [Cin+Cout:Cin+2*Cout]
    repack(x21.reshape(H, W, C))
    h2 = dw3x3_bn_relu6(dw2w_ref, aff3_ref)
    z2 = pw_bn_relu6(h2, pw2w_ref, aff4_ref)
    x31 = x21 + z2                                                # == cat(x21, x22)

    # conv3: dense 3x3 as nine accumulated MXU matmuls over shifted slices.
    repack(x31.reshape(H, W, C))
    acc = jnp.zeros((H * W, C), f32)
    for kh in range(3):
        for kw in range(3):
            tap = pad_ref[kh:kh + H, _OFF - 1 + kw:_OFF - 1 + kw + W, :]
            tap = tap.reshape(H * W, C).astype(jnp.bfloat16)
            acc = acc + jnp.dot(tap, c3w_ref[kh * 3 + kw],
                                preferred_element_type=f32)
    y = acc * aff5_ref[0] + aff5_ref[1]          # conv bias + final BN folded in
    o_ref[...] = y.reshape(H, W, C)              # lane-dense (128-lane) store


def _fused_block_call(xp, kp, H, W):
    """xp: (N, H, W, 128) f32 channel-padded input -> (N, H, W, 128) f32."""
    N = xp.shape[0]

    def _bcast(shape):
        zeros = (0,) * len(shape)
        return pl.BlockSpec(shape, lambda n: zeros)

    kernel = functools.partial(_down_block_kernel, H=H, W=W)
    return pl.pallas_call(
        kernel,
        out_shape=jax.ShapeDtypeStruct((N, H, W, LANES), jnp.float32),
        grid=(N,),
        in_specs=[
            pl.BlockSpec((None, H, W, LANES), lambda n: (n, 0, 0, 0)),
            _bcast((9, 1, LANES)),        # dw1 weights
            _bcast((2, 1, LANES)),        # dw1 BN scale/shift
            _bcast((LANES, LANES)),       # pw1 weights (bf16, channel-offset)
            _bcast((2, 1, LANES)),        # pw1 BN
            _bcast((9, 1, LANES)),        # dw2 weights
            _bcast((2, 1, LANES)),        # dw2 BN
            _bcast((LANES, LANES)),       # pw2 weights (bf16, channel-offset)
            _bcast((2, 1, LANES)),        # pw2 BN
            _bcast((9, LANES, LANES)),    # conv3 weights (bf16)
            _bcast((2, 1, LANES)),        # conv3 bias + final BN (folded)
        ],
        out_specs=pl.BlockSpec((None, H, W, LANES), lambda n: (n, 0, 0, 0)),
        scratch_shapes=[pltpu.VMEM((H + 2, W + 2 * _OFF, LANES), jnp.float32)],
        compiler_params=pltpu.CompilerParams(
            dimension_semantics=("parallel",)),
    )(xp, kp["dw1_w"], kp["aff1"], kp["pw1_w"], kp["aff2"],
      kp["dw2_w"], kp["aff3"], kp["pw2_w"], kp["aff4"],
      kp["c3_w"], kp["aff5"])


# ---------------------------------------------------------------------------
# Parameters (PyTorch-equivalent raw params + packing into kernel layout)
# ---------------------------------------------------------------------------
def _make_bn(key, c):
    """Deterministic synthetic BN (inference mode) folded into scale/shift."""
    k1, k2, k3, k4 = jax.random.split(key, 4)
    gamma = 1.0 + 0.1 * jax.random.normal(k1, (c,))
    beta = 0.1 * jax.random.normal(k2, (c,))
    mean = 0.1 * jax.random.normal(k3, (c,))
    var = jax.random.uniform(k4, (c,), minval=0.5, maxval=1.5)
    scale = gamma / jnp.sqrt(var + BN_EPS)
    shift = beta - mean * scale
    return scale.astype(jnp.float32), shift.astype(jnp.float32)


def init_block_params(key, cin, cout):
    ks = jax.random.split(key, 11)
    cmid = cin + cout
    c3in = cin + 2 * cout
    return {
        "dw1_w": jax.random.normal(ks[0], (3, 3, cin), jnp.float32) * (2.0 / 9.0) ** 0.5,
        "dw1_bn": _make_bn(ks[1], cin),
        "pw1_w": jax.random.normal(ks[2], (cin, cout), jnp.float32) * (2.0 / cin) ** 0.5,
        "pw1_bn": _make_bn(ks[3], cout),
        "dw2_w": jax.random.normal(ks[4], (3, 3, cmid), jnp.float32) * (2.0 / 9.0) ** 0.5,
        "dw2_bn": _make_bn(ks[5], cmid),
        "pw2_w": jax.random.normal(ks[6], (cmid, cout), jnp.float32) * (2.0 / cmid) ** 0.5,
        "pw2_bn": _make_bn(ks[7], cout),
        "c3_w": jax.random.normal(ks[8], (3, 3, c3in, cout), jnp.float32) * (2.0 / (9.0 * c3in)) ** 0.5,
        "c3_b": 0.1 * jax.random.normal(ks[9], (cout,), jnp.float32),
        "c3_bn": _make_bn(ks[10], cout),
        "cin": cin,
        "cout": cout,
    }


def pack_block_params(p):
    """Pad / fold the raw parameters into the 128-lane kernel layout."""
    cin, cout = p["cin"], p["cout"]
    cmid = cin + cout          # channels of x21 = cat(x, x12)
    c3in = cmid + cout         # channels of x31 = cat(x21, x22)
    assert c3in <= LANES, "channel count exceeds one lane group"

    def pad_dw(w, c):
        wp = jnp.zeros((9, 1, LANES), jnp.float32)
        return wp.at[:, 0, :c].set(w.reshape(9, c))

    def pad_aff(scale, shift, off, c):
        a = jnp.zeros((2, 1, LANES), jnp.float32)
        a = a.at[0, 0, off:off + c].set(scale)
        a = a.at[1, 0, off:off + c].set(shift)
        return a

    def pad_pw(w, c_in, off_out, c_out):
        wp = jnp.zeros((LANES, LANES), jnp.float32)
        wp = wp.at[:c_in, off_out:off_out + c_out].set(w)
        return wp.astype(jnp.bfloat16)

    # conv3 bias folded into the final BN:  bn(y + b) = s*y + (s*b + t)
    s3, t3 = p["c3_bn"]
    t3 = t3 + s3 * p["c3_b"]
    c3p = jnp.zeros((9, LANES, LANES), jnp.float32)
    c3p = c3p.at[:, :c3in, :cout].set(p["c3_w"].reshape(9, c3in, cout))

    return {
        "dw1_w": pad_dw(p["dw1_w"], cin),
        "aff1": pad_aff(*p["dw1_bn"], 0, cin),
        "pw1_w": pad_pw(p["pw1_w"], cin, cin, cout),      # x12 -> lanes [cin:cmid]
        "aff2": pad_aff(*p["pw1_bn"], cin, cout),
        "dw2_w": pad_dw(p["dw2_w"], cmid),
        "aff3": pad_aff(*p["dw2_bn"], 0, cmid),
        "pw2_w": pad_pw(p["pw2_w"], cmid, cmid, cout),    # x22 -> lanes [cmid:c3in]
        "aff4": pad_aff(*p["pw2_bn"], cmid, cout),
        "c3_w": c3p.astype(jnp.bfloat16),
        "aff5": pad_aff(s3, t3, 0, cout),
        "cout": cout,
    }


# ---------------------------------------------------------------------------
# Forward (host-side glue: AvgPool2d, NCHW<->NHWC, channel pad/slice)
# ---------------------------------------------------------------------------
@functools.partial(jax.jit, static_argnames=("down_size", "cout"))
def _forward(x_nchw, kp, down_size, cout):
    x = jnp.transpose(x_nchw, (0, 2, 3, 1)).astype(jnp.float32)   # NCHW -> NHWC
    if down_size is not None:                                     # AvgPool2d(down_size)
        N, H, W, C = x.shape
        x = jnp.mean(
            x.reshape(N, H // down_size, down_size, W // down_size, down_size, C),
            axis=(2, 4))
    N, H, W, cin = x.shape
    xp = jnp.pad(x, ((0, 0), (0, 0), (0, 0), (0, LANES - cin)))   # channels -> lanes
    out_p = _fused_block_call(xp, kp, H, W)                       # (N, H, W, 128)
    out = out_p[..., :cout]                                       # drop lane padding
    return jnp.transpose(out, (0, 3, 1, 2))                       # back to NCHW


def densenet2d_down_block_mobile_2(x_nchw, packed, down_size=None):
    kp = {k: v for k, v in packed.items() if k != "cout"}
    return _forward(x_nchw, kp, down_size=down_size, cout=packed["cout"])


# ---------------------------------------------------------------------------
# Pure-JAX reference (for correctness checking only)
# ---------------------------------------------------------------------------
def _reference_forward(x_nchw, p, down_size):
    x = jnp.transpose(x_nchw, (0, 2, 3, 1)).astype(jnp.float32)
    if down_size is not None:
        N, H, W, C = x.shape
        x = jnp.mean(
            x.reshape(N, H // down_size, down_size, W // down_size, down_size, C),
            axis=(2, 4))

    def dw(v, w, bn):
        N, H, W, C = v.shape
        vp = jnp.pad(v, ((0, 0), (1, 1), (1, 1), (0, 0)))
        acc = jnp.zeros_like(v)
        for kh in range(3):
            for kw in range(3):
                acc = acc + vp[:, kh:kh + H, kw:kw + W, :] * w[kh, kw]
        return jnp.clip(acc * bn[0] + bn[1], 0.0, 6.0)

    def pw(v, w, bn):
        y = jnp.einsum("nhwc,cd->nhwd", v, w)
        return jnp.clip(y * bn[0] + bn[1], 0.0, 6.0)

    def conv3(v, w, b, bn):
        N, H, W, C = v.shape
        vp = jnp.pad(v, ((0, 0), (1, 1), (1, 1), (0, 0)))
        acc = jnp.zeros((N, H, W, w.shape[-1]), jnp.float32)
        for kh in range(3):
            for kw in range(3):
                acc = acc + jnp.einsum("nhwc,cd->nhwd",
                                       vp[:, kh:kh + H, kw:kw + W, :], w[kh, kw])
        return (acc + b) * bn[0] + bn[1]

    x12 = pw(dw(x, p["dw1_w"], p["dw1_bn"]), p["pw1_w"], p["pw1_bn"])
    x21 = jnp.concatenate([x, x12], axis=-1)
    x22 = pw(dw(x21, p["dw2_w"], p["dw2_bn"]), p["pw2_w"], p["pw2_bn"])
    x31 = jnp.concatenate([x21, x22], axis=-1)
    out = conv3(x31, p["c3_w"], p["c3_b"], p["c3_bn"])
    return jnp.transpose(out, (0, 3, 1, 2))


# ---------------------------------------------------------------------------
if __name__ == "__main__":
    key = jax.random.PRNGKey(0)
    kx, kparam = jax.random.split(key)

    N, C_IN, H, W = 2, 4, 16, 16      # input (NCHW)
    C_OUT = 32
    DOWN_SIZE = 2                     # AvgPool2d(2) -> block runs on 8x8

    x = jax.random.normal(kx, (N, C_IN, H, W), jnp.float32)
    raw = init_block_params(kparam, C_IN, C_OUT)
    packed = pack_block_params(raw)

    out = densenet2d_down_block_mobile_2(x, packed, down_size=DOWN_SIZE)
    out = jax.block_until_ready(out)

    assert out.shape == (N, C_OUT, H // DOWN_SIZE, W // DOWN_SIZE), out.shape
    assert bool(jnp.all(jnp.isfinite(out)))

    # Correctness vs the pure-JAX reference (loose tol: pw/conv3 operands are bf16).
    ref = _reference_forward(x, raw, DOWN_SIZE)
    rel_err = float(jnp.max(jnp.abs(out - ref)) / (1e-3 + jnp.max(jnp.abs(ref))))
    assert rel_err < 0.1, rel_err

    print("KERNEL_OK")
</pallas_src>

<mosaic_0001>
module attributes {stable_mosaic.version = 11 : i64} {
  func.func @_down_block_kernel(%arg0: i32, %arg1: memref<1x8x8x128xf32, #tpu.memory_space<vmem>>, %arg2: memref<9x1x128xf32, #tpu.memory_space<vmem>>, %arg3: memref<2x1x128xf32, #tpu.memory_space<vmem>>, %arg4: memref<128x128xbf16, #tpu.memory_space<vmem>>, %arg5: memref<2x1x128xf32, #tpu.memory_space<vmem>>, %arg6: memref<9x1x128xf32, #tpu.memory_space<vmem>>, %arg7: memref<2x1x128xf32, #tpu.memory_space<vmem>>, %arg8: memref<128x128xbf16, #tpu.memory_space<vmem>>, %arg9: memref<2x1x128xf32, #tpu.memory_space<vmem>>, %arg10: memref<9x128x128xbf16, #tpu.memory_space<vmem>>, %arg11: memref<2x1x128xf32, #tpu.memory_space<vmem>>, %arg12: memref<1x8x8x128xf32, #tpu.memory_space<vmem>>, %arg13: memref<10x24x128xf32, #tpu.memory_space<vmem>>) attributes {dimension_semantics = [#tpu.dimension_semantics<parallel>], iteration_bounds = array<i64: 2>, scalar_prefetch = 0 : i64, scratch_operands = 1 : i64, tpu.core_type = #tpu.core_type<tc>, window_params = [{transform_indices = @transform_0, window_bounds = array<i64: 1, 8, 8, 128>}, {pipeline_mode = #tpu.pipeline_mode<synchronous>, transform_indices = @transform_1, window_bounds = array<i64: 9, 1, 128>}, {pipeline_mode = #tpu.pipeline_mode<synchronous>, transform_indices = @transform_2, window_bounds = array<i64: 2, 1, 128>}, {pipeline_mode = #tpu.pipeline_mode<synchronous>, transform_indices = @transform_3, window_bounds = array<i64: 128, 128>}, {pipeline_mode = #tpu.pipeline_mode<synchronous>, transform_indices = @transform_4, window_bounds = array<i64: 2, 1, 128>}, {pipeline_mode = #tpu.pipeline_mode<synchronous>, transform_indices = @transform_5, window_bounds = array<i64: 9, 1, 128>}, {pipeline_mode = #tpu.pipeline_mode<synchronous>, transform_indices = @transform_6, window_bounds = array<i64: 2, 1, 128>}, {pipeline_mode = #tpu.pipeline_mode<synchronous>, transform_indices = @transform_7, window_bounds = array<i64: 128, 128>}, {pipeline_mode = #tpu.pipeline_mode<synchronous>, transform_indices = @transform_8, window_bounds = array<i64: 2, 1, 128>}, {pipeline_mode = #tpu.pipeline_mode<synchronous>, transform_indices = @transform_9, window_bounds = array<i64: 9, 128, 128>}, {pipeline_mode = #tpu.pipeline_mode<synchronous>, transform_indices = @transform_10, window_bounds = array<i64: 2, 1, 128>}, {transform_indices = @transform_11, window_bounds = array<i64: 1, 8, 8, 128>}]} {
    %cst = arith.constant 0.000000e+00 : f32
    %0 = vector.broadcast %cst : f32 to vector<10x24x128xf32>
    %c0 = arith.constant 0 : index
    %c0_0 = arith.constant 0 : index
    %c0_1 = arith.constant 0 : index
    %1 = vector.load %arg13[%c0, %c0_0, %c0_1] : memref<10x24x128xf32, #tpu.memory_space<vmem>>, vector<10x24x128xf32>
    tpu.vector_store %arg13[%c0, %c0_0, %c0_1], %0 {strides = array<i32>} : memref<10x24x128xf32, #tpu.memory_space<vmem>>, vector<10x24x128xf32>,
    %c0_2 = arith.constant 0 : index
    %c0_3 = arith.constant 0 : index
    %c0_4 = arith.constant 0 : index
    %c0_5 = arith.constant 0 : index
    %2 = vector.load %arg1[%c0_2, %c0_3, %c0_4, %c0_5] : memref<1x8x8x128xf32, #tpu.memory_space<vmem>>, vector<1x8x8x128xf32>
    %3 = vector.shape_cast %2 : vector<1x8x8x128xf32> to vector<8x8x128xf32>
    %c1 = arith.constant 1 : index
    %c8 = arith.constant 8 : index
    %c0_6 = arith.constant 0 : index
    %4 = vector.load %arg13[%c1, %c8, %c0_6] : memref<10x24x128xf32, #tpu.memory_space<vmem>>, vector<8x8x128xf32>
    tpu.vector_store %arg13[%c1, %c8, %c0_6], %3 {strides = array<i32>} : memref<10x24x128xf32, #tpu.memory_space<vmem>>, vector<8x8x128xf32>,
    %cst_7 = arith.constant 0.000000e+00 : f32
    %5 = vector.broadcast %cst_7 : f32 to vector<8x8x128xf32>
    %c0_8 = arith.constant 0 : index
    %c7 = arith.constant 7 : index
    %c0_9 = arith.constant 0 : index
    %6 = vector.load %arg13[%c0_8, %c7, %c0_9] : memref<10x24x128xf32, #tpu.memory_space<vmem>>, vector<8x8x128xf32>
    %c0_10 = arith.constant 0 : index
    %c0_11 = arith.constant 0 : index
    %c0_12 = arith.constant 0 : index
    %7 = vector.load %arg2[%c0_10, %c0_11, %c0_12] : memref<9x1x128xf32, #tpu.memory_space<vmem>>, vector<1x1x128xf32>
    %8 = vector.shape_cast %7 : vector<1x1x128xf32> to vector<1x128xf32>
    %9 = vector.shape_cast %8 : vector<1x128xf32> to vector<1x1x128xf32>
    %10 = vector.broadcast %9 : vector<1x1x128xf32> to vector<8x8x128xf32>
    %11 = arith.mulf %6, %10 : vector<8x8x128xf32>
    %12 = arith.addf %5, %11 : vector<8x8x128xf32>
    %c0_13 = arith.constant 0 : index
    %c8_14 = arith.constant 8 : index
    %c0_15 = arith.constant 0 : index
    %13 = vector.load %arg13[%c0_13, %c8_14, %c0_15] : memref<10x24x128xf32, #tpu.memory_space<vmem>>, vector<8x8x128xf32>
    %c1_16 = arith.constant 1 : index
    %c0_17 = arith.constant 0 : index
    %c0_18 = arith.constant 0 : index
    %14 = vector.load %arg2[%c1_16, %c0_17, %c0_18] : memref<9x1x128xf32, #tpu.memory_space<vmem>>, vector<1x1x128xf32>
    %15 = vector.shape_cast %14 : vector<1x1x128xf32> to vector<1x128xf32>
    %16 = vector.shape_cast %15 : vector<1x128xf32> to vector<1x1x128xf32>
    %17 = vector.broadcast %16 : vector<1x1x128xf32> to vector<8x8x128xf32>
    %18 = arith.mulf %13, %17 : vector<8x8x128xf32>
    %19 = arith.addf %12, %18 : vector<8x8x128xf32>
    %c0_19 = arith.constant 0 : index
    %c9 = arith.constant 9 : index
    %c0_20 = arith.constant 0 : index
    %20 = vector.load %arg13[%c0_19, %c9, %c0_20] : memref<10x24x128xf32, #tpu.memory_space<vmem>>, vector<8x8x128xf32>
    %c2 = arith.constant 2 : index
    %c0_21 = arith.constant 0 : index
    %c0_22 = arith.constant 0 : index
    %21 = vector.load %arg2[%c2, %c0_21, %c0_22] : memref<9x1x128xf32, #tpu.memory_space<vmem>>, vector<1x1x128xf32>
    %22 = vector.shape_cast %21 : vector<1x1x128xf32> to vector<1x128xf32>
    %23 = vector.shape_cast %22 : vector<1x128xf32> to vector<1x1x128xf32>
    %24 = vector.broadcast %23 : vector<1x1x128xf32> to vector<8x8x128xf32>
    %25 = arith.mulf %20, %24 : vector<8x8x128xf32>
    %26 = arith.addf %19, %25 : vector<8x8x128xf32>
    %c1_23 = arith.constant 1 : index
    %c7_24 = arith.constant 7 : index
    %c0_25 = arith.constant 0 : index
    %27 = vector.load %arg13[%c1_23, %c7_24, %c0_25] : memref<10x24x128xf32, #tpu.memory_space<vmem>>, vector<8x8x128xf32>
    %c3 = arith.constant 3 : index
    %c0_26 = arith.constant 0 : index
    %c0_27 = arith.constant 0 : index
    %28 = vector.load %arg2[%c3, %c0_26, %c0_27] : memref<9x1x128xf32, #tpu.memory_space<vmem>>, vector<1x1x128xf32>
    %29 = vector.shape_cast %28 : vector<1x1x128xf32> to vector<1x128xf32>
    %30 = vector.shape_cast %29 : vector<1x128xf32> to vector<1x1x128xf32>
    %31 = vector.broadcast %30 : vector<1x1x128xf32> to vector<8x8x128xf32>
    %32 = arith.mulf %27, %31 : vector<8x8x128xf32>
    %33 = arith.addf %26, %32 : vector<8x8x128xf32>
    %c1_28 = arith.constant 1 : index
    %c8_29 = arith.constant 8 : index
    %c0_30 = arith.constant 0 : index
    %34 = vector.load %arg13[%c1_28, %c8_29, %c0_30] : memref<10x24x128xf32, #tpu.memory_space<vmem>>, vector<8x8x128xf32>
    %c4 = arith.constant 4 : index
    %c0_31 = arith.constant 0 : index
    %c0_32 = arith.constant 0 : index
    %35 = vector.load %arg2[%c4, %c0_31, %c0_32] : memref<9x1x128xf32, #tpu.memory_space<vmem>>, vector<1x1x128xf32>
    %36 = vector.shape_cast %35 : vector<1x1x128xf32> to vector<1x128xf32>
    %37 = vector.shape_cast %36 : vector<1x128xf32> to vector<1x1x128xf32>
    %38 = vector.broadcast %37 : vector<1x1x128xf32> to vector<8x8x128xf32>
    %39 = arith.mulf %34, %38 : vector<8x8x128xf32>
    %40 = arith.addf %33, %39 : vector<8x8x128xf32>
    %c1_33 = arith.constant 1 : index
    %c9_34 = arith.constant 9 : index
    %c0_35 = arith.constant 0 : index
    %41 = vector.load %arg13[%c1_33, %c9_34, %c0_35] : memref<10x24x128xf32, #tpu.memory_space<vmem>>, vector<8x8x128xf32>
    %c5 = arith.constant 5 : index
    %c0_36 = arith.constant 0 : index
    %c0_37 = arith.constant 0 : index
    %42 = vector.load %arg2[%c5, %c0_36, %c0_37] : memref<9x1x128xf32, #tpu.memory_space<vmem>>, vector<1x1x128xf32>
    %43 = vector.shape_cast %42 : vector<1x1x128xf32> to vector<1x128xf32>
    %44 = vector.shape_cast %43 : vector<1x128xf32> to vector<1x1x128xf32>
    %45 = vector.broadcast %44 : vector<1x1x128xf32> to vector<8x8x128xf32>
    %46 = arith.mulf %41, %45 : vector<8x8x128xf32>
    %47 = arith.addf %40, %46 : vector<8x8x128xf32>
    %c2_38 = arith.constant 2 : index
    %c7_39 = arith.constant 7 : index
    %c0_40 = arith.constant 0 : index
    %48 = vector.load %arg13[%c2_38, %c7_39, %c0_40] : memref<10x24x128xf32, #tpu.memory_space<vmem>>, vector<8x8x128xf32>
    %c6 = arith.constant 6 : index
    %c0_41 = arith.constant 0 : index
    %c0_42 = arith.constant 0 : index
    %49 = vector.load %arg2[%c6, %c0_41, %c0_42] : memref<9x1x128xf32, #tpu.memory_space<vmem>>, vector<1x1x128xf32>
    %50 = vector.shape_cast %49 : vector<1x1x128xf32> to vector<1x128xf32>
    %51 = vector.shape_cast %50 : vector<1x128xf32> to vector<1x1x128xf32>
    %52 = vector.broadcast %51 : vector<1x1x128xf32> to vector<8x8x128xf32>
    %53 = arith.mulf %48, %52 : vector<8x8x128xf32>
    %54 = arith.addf %47, %53 : vector<8x8x128xf32>
    %c2_43 = arith.constant 2 : index
    %c8_44 = arith.constant 8 : index
    %c0_45 = arith.constant 0 : index
    %55 = vector.load %arg13[%c2_43, %c8_44, %c0_45] : memref<10x24x128xf32, #tpu.memory_space<vmem>>, vector<8x8x128xf32>
    %c7_46 = arith.constant 7 : index
    %c0_47 = arith.constant 0 : index
    %c0_48 = arith.constant 0 : index
    %56 = vector.load %arg2[%c7_46, %c0_47, %c0_48] : memref<9x1x128xf32, #tpu.memory_space<vmem>>, vector<1x1x128xf32>
    %57 = vector.shape_cast %56 : vector<1x1x128xf32> to vector<1x128xf32>
    %58 = vector.shape_cast %57 : vector<1x128xf32> to vector<1x1x128xf32>
    %59 = vector.broadcast %58 : vector<1x1x128xf32> to vector<8x8x128xf32>
    %60 = arith.mulf %55, %59 : vector<8x8x128xf32>
    %61 = arith.addf %54, %60 : vector<8x8x128xf32>
    %c2_49 = arith.constant 2 : index
    %c9_50 = arith.constant 9 : index
    %c0_51 = arith.constant 0 : index
    %62 = vector.load %arg13[%c2_49, %c9_50, %c0_51] : memref<10x24x128xf32, #tpu.memory_space<vmem>>, vector<8x8x128xf32>
    %c8_52 = arith.constant 8 : index
    %c0_53 = arith.constant 0 : index
    %c0_54 = arith.constant 0 : index
    %63 = vector.load %arg2[%c8_52, %c0_53, %c0_54] : memref<9x1x128xf32, #tpu.memory_space<vmem>>, vector<1x1x128xf32>
    %64 = vector.shape_cast %63 : vector<1x1x128xf32> to vector<1x128xf32>
    %65 = vector.shape_cast %64 : vector<1x128xf32> to vector<1x1x128xf32>
    %66 = vector.broadcast %65 : vector<1x1x128xf32> to vector<8x8x128xf32>
    %67 = arith.mulf %62, %66 : vector<8x8x128xf32>
    %68 = arith.addf %61, %67 : vector<8x8x128xf32>
    %c0_55 = arith.constant 0 : index
    %c0_56 = arith.constant 0 : index
    %c0_57 = arith.constant 0 : index
    %69 = vector.load %arg3[%c0_55, %c0_56, %c0_57] : memref<2x1x128xf32, #tpu.memory_space<vmem>>, vector<1x1x128xf32>
    %70 = vector.shape_cast %69 : vector<1x1x128xf32> to vector<1x128xf32>
    %71 = vector.shape_cast %70 : vector<1x128xf32> to vector<1x1x128xf32>
    %72 = vector.broadcast %71 : vector<1x1x128xf32> to vector<8x8x128xf32>
    %73 = arith.mulf %68, %72 : vector<8x8x128xf32>
    %c1_58 = arith.constant 1 : index
    %c0_59 = arith.constant 0 : index
    %c0_60 = arith.constant 0 : index
    %74 = vector.load %arg3[%c1_58, %c0_59, %c0_60] : memref<2x1x128xf32, #tpu.memory_space<vmem>>, vector<1x1x128xf32>
    %75 = vector.shape_cast %74 : vector<1x1x128xf32> to vector<1x128xf32>
    %76 = vector.shape_cast %75 : vector<1x128xf32> to vector<1x1x128xf32>
    %77 = vector.broadcast %76 : vector<1x1x128xf32> to vector<8x8x128xf32>
    %78 = arith.addf %73, %77 : vector<8x8x128xf32>
    %cst_61 = arith.constant 0.000000e+00 : f32
    %cst_62 = arith.constant 6.000000e+00 : f32
    %79 = vector.broadcast %cst_61 : f32 to vector<8x8x128xf32>
    %80 = arith.maximumf %79, %78 : vector<8x8x128xf32>
    %81 = vector.broadcast %cst_62 : f32 to vector<8x8x128xf32>
    %82 = arith.minimumf %81, %80 : vector<8x8x128xf32>
    %83 = vector.shape_cast %82 : vector<8x8x128xf32> to vector<64x128xf32>
    %84 = arith.truncf %83 : vector<64x128xf32> to vector<64x128xbf16>
    %c0_63 = arith.constant 0 : index
    %c0_64 = arith.constant 0 : index
    %85 = vector.load %arg4[%c0_63, %c0_64] : memref<128x128xbf16, #tpu.memory_space<vmem>>, vector<128x128xbf16>
    %cst_65 = arith.constant dense<0.000000e+00> : vector<64x128xf32>
    %86 = tpu.matmul %84, %85, %cst_65 {dimension_numbers = #tpu.dot_dimension_numbers<[1], [0], [0], [1], [0, 0, 1, 1], [], []>} : vector<64x128xbf16>, vector<128x128xbf16>, vector<64x128xf32> -> vector<64x128xf32>
    %c0_66 = arith.constant 0 : index
    %c0_67 = arith.constant 0 : index
    %c0_68 = arith.constant 0 : index
    %87 = vector.load %arg5[%c0_66, %c0_67, %c0_68] : memref<2x1x128xf32, #tpu.memory_space<vmem>>, vector<1x1x128xf32>
    %88 = vector.shape_cast %87 : vector<1x1x128xf32> to vector<1x128xf32>
    %89 = vector.broadcast %88 : vector<1x128xf32> to vector<64x128xf32>
    %90 = arith.mulf %86, %89 : vector<64x128xf32>
    %c1_69 = arith.constant 1 : index
    %c0_70 = arith.constant 0 : index
    %c0_71 = arith.constant 0 : index
    %91 = vector.load %arg5[%c1_69, %c0_70, %c0_71] : memref<2x1x128xf32, #tpu.memory_space<vmem>>, vector<1x1x128xf32>
    %92 = vector.shape_cast %91 : vector<1x1x128xf32> to vector<1x128xf32>
    %93 = vector.broadcast %92 : vector<1x128xf32> to vector<64x128xf32>
    %94 = arith.addf %90, %93 : vector<64x128xf32>
    %cst_72 = arith.constant 0.000000e+00 : f32
    %cst_73 = arith.constant 6.000000e+00 : f32
    %95 = vector.broadcast %cst_72 : f32 to vector<64x128xf32>
    %96 = arith.maximumf %95, %94 : vector<64x128xf32>
    %97 = vector.broadcast %cst_73 : f32 to vector<64x128xf32>
    %98 = arith.minimumf %97, %96 : vector<64x128xf32>
    %99 = vector.shape_cast %3 : vector<8x8x128xf32> to vector<64x128xf32>
    %100 = arith.addf %99, %98 : vector<64x128xf32>
    %101 = vector.shape_cast %100 : vector<64x128xf32> to vector<8x8x128xf32>
    %c1_74 = arith.constant 1 : index
    %c8_75 = arith.constant 8 : index
    %c0_76 = arith.constant 0 : index
    %102 = vector.load %arg13[%c1_74, %c8_75, %c0_76] : memref<10x24x128xf32, #tpu.memory_space<vmem>>, vector<8x8x128xf32>
    tpu.vector_store %arg13[%c1_74, %c8_75, %c0_76], %101 {strides = array<i32>} : memref<10x24x128xf32, #tpu.memory_space<vmem>>, vector<8x8x128xf32>,
    %cst_77 = arith.constant 0.000000e+00 : f32
    %103 = vector.broadcast %cst_77 : f32 to vector<8x8x128xf32>
    %c0_78 = arith.constant 0 : index
    %c7_79 = arith.constant 7 : index
    %c0_80 = arith.constant 0 : index
    %104 = vector.load %arg13[%c0_78, %c7_79, %c0_80] : memref<10x24x128xf32, #tpu.memory_space<vmem>>, vector<8x8x128xf32>
    %c0_81 = arith.constant 0 : index
    %c0_82 = arith.constant 0 : index
    %c0_83 = arith.constant 0 : index
    %105 = vector.load %arg6[%c0_81, %c0_82, %c0_83] : memref<9x1x128xf32, #tpu.memory_space<vmem>>, vector<1x1x128xf32>
    %106 = vector.shape_cast %105 : vector<1x1x128xf32> to vector<1x128xf32>
    %107 = vector.shape_cast %106 : vector<1x128xf32> to vector<1x1x128xf32>
    %108 = vector.broadcast %107 : vector<1x1x128xf32> to vector<8x8x128xf32>
    %109 = arith.mulf %104, %108 : vector<8x8x128xf32>
    %110 = arith.addf %103, %109 : vector<8x8x128xf32>
    %c0_84 = arith.constant 0 : index
    %c8_85 = arith.constant 8 : index
    %c0_86 = arith.constant 0 : index
    %111 = vector.load %arg13[%c0_84, %c8_85, %c0_86] : memref<10x24x128xf32, #tpu.memory_space<vmem>>, vector<8x8x128xf32>
    %c1_87 = arith.constant 1 : index
    %c0_88 = arith.constant 0 : index
    %c0_89 = arith.constant 0 : index
    %112 = vector.load %arg6[%c1_87, %c0_88, %c0_89] : memref<9x1x128xf32, #tpu.memory_space<vmem>>, vector<1x1x128xf32>
    %113 = vector.shape_cast %112 : vector<1x1x128xf32> to vector<1x128xf32>
    %114 = vector.shape_cast %113 : vector<1x128xf32> to vector<1x1x128xf32>
    %115 = vector.broadcast %114 : vector<1x1x128xf32> to vector<8x8x128xf32>
    %116 = arith.mulf %111, %115 : vector<8x8x128xf32>
    %117 = arith.addf %110, %116 : vector<8x8x128xf32>
    %c0_90 = arith.constant 0 : index
    %c9_91 = arith.constant 9 : index
    %c0_92 = arith.constant 0 : index
    %118 = vector.load %arg13[%c0_90, %c9_91, %c0_92] : memref<10x24x128xf32, #tpu.memory_space<vmem>>, vector<8x8x128xf32>
    %c2_93 = arith.constant 2 : index
    %c0_94 = arith.constant 0 : index
    %c0_95 = arith.constant 0 : index
    %119 = vector.load %arg6[%c2_93, %c0_94, %c0_95] : memref<9x1x128xf32, #tpu.memory_space<vmem>>, vector<1x1x128xf32>
    %120 = vector.shape_cast %119 : vector<1x1x128xf32> to vector<1x128xf32>
    %121 = vector.shape_cast %120 : vector<1x128xf32> to vector<1x1x128xf32>
    %122 = vector.broadcast %121 : vector<1x1x128xf32> to vector<8x8x128xf32>
    %123 = arith.mulf %118, %122 : vector<8x8x128xf32>
    %124 = arith.addf %117, %123 : vector<8x8x128xf32>
    %c1_96 = arith.constant 1 : index
    %c7_97 = arith.constant 7 : index
    %c0_98 = arith.constant 0 : index
    %125 = vector.load %arg13[%c1_96, %c7_97, %c0_98] : memref<10x24x128xf32, #tpu.memory_space<vmem>>, vector<8x8x128xf32>
    %c3_99 = arith.constant 3 : index
    %c0_100 = arith.constant 0 : index
    %c0_101 = arith.constant 0 : index
    %126 = vector.load %arg6[%c3_99, %c0_100, %c0_101] : memref<9x1x128xf32, #tpu.memory_space<vmem>>, vector<1x1x128xf32>
    %127 = vector.shape_cast %126 : vector<1x1x128xf32> to vector<1x128xf32>
    %128 = vector.shape_cast %127 : vector<1x128xf32> to vector<1x1x128xf32>
    %129 = vector.broadcast %128 : vector<1x1x128xf32> to vector<8x8x128xf32>
    %130 = arith.mulf %125, %129 : vector<8x8x128xf32>
    %131 = arith.addf %124, %130 : vector<8x8x128xf32>
    %c1_102 = arith.constant 1 : index
    %c8_103 = arith.constant 8 : index
    %c0_104 = arith.constant 0 : index
    %132 = vector.load %arg13[%c1_102, %c8_103, %c0_104] : memref<10x24x128xf32, #tpu.memory_space<vmem>>, vector<8x8x128xf32>
    %c4_105 = arith.constant 4 : index
    %c0_106 = arith.constant 0 : index
    %c0_107 = arith.constant 0 : index
    %133 = vector.load %arg6[%c4_105, %c0_106, %c0_107] : memref<9x1x128xf32, #tpu.memory_space<vmem>>, vector<1x1x128xf32>
    %134 = vector.shape_cast %133 : vector<1x1x128xf32> to vector<1x128xf32>
    %135 = vector.shape_cast %134 : vector<1x128xf32> to vector<1x1x128xf32>
    %136 = vector.broadcast %135 : vector<1x1x128xf32> to vector<8x8x128xf32>
    %137 = arith.mulf %132, %136 : vector<8x8x128xf32>
    %138 = arith.addf %131, %137 : vector<8x8x128xf32>
    %c1_108 = arith.constant 1 : index
    %c9_109 = arith.constant 9 : index
    %c0_110 = arith.constant 0 : index
    %139 = vector.load %arg13[%c1_108, %c9_109, %c0_110] : memref<10x24x128xf32, #tpu.memory_space<vmem>>, vector<8x8x128xf32>
    %c5_111 = arith.constant 5 : index
    %c0_112 = arith.constant 0 : index
    %c0_113 = arith.constant 0 : index
    %140 = vector.load %arg6[%c5_111, %c0_112, %c0_113] : memref<9x1x128xf32, #tpu.memory_space<vmem>>, vector<1x1x128xf32>
    %141 = vector.shape_cast %140 : vector<1x1x128xf32> to vector<1x128xf32>
    %142 = vector.shape_cast %141 : vector<1x128xf32> to vector<1x1x128xf32>
    %143 = vector.broadcast %142 : vector<1x1x128xf32> to vector<8x8x128xf32>
    %144 = arith.mulf %139, %143 : vector<8x8x128xf32>
    %145 = arith.addf %138, %144 : vector<8x8x128xf32>
    %c2_114 = arith.constant 2 : index
    %c7_115 = arith.constant 7 : index
    %c0_116 = arith.constant 0 : index
    %146 = vector.load %arg13[%c2_114, %c7_115, %c0_116] : memref<10x24x128xf32, #tpu.memory_space<vmem>>, vector<8x8x128xf32>
    %c6_117 = arith.constant 6 : index
    %c0_118 = arith.constant 0 : index
    %c0_119 = arith.constant 0 : index
    %147 = vector.load %arg6[%c6_117, %c0_118, %c0_119] : memref<9x1x128xf32, #tpu.memory_space<vmem>>, vector<1x1x128xf32>
    %148 = vector.shape_cast %147 : vector<1x1x128xf32> to vector<1x128xf32>
    %149 = vector.shape_cast %148 : vector<1x128xf32> to vector<1x1x128xf32>
    %150 = vector.broadcast %149 : vector<1x1x128xf32> to vector<8x8x128xf32>
    %151 = arith.mulf %146, %150 : vector<8x8x128xf32>
    %152 = arith.addf %145, %151 : vector<8x8x128xf32>
    %c2_120 = arith.constant 2 : index
    %c8_121 = arith.constant 8 : index
    %c0_122 = arith.constant 0 : index
    %153 = vector.load %arg13[%c2_120, %c8_121, %c0_122] : memref<10x24x128xf32, #tpu.memory_space<vmem>>, vector<8x8x128xf32>
    %c7_123 = arith.constant 7 : index
    %c0_124 = arith.constant 0 : index
    %c0_125 = arith.constant 0 : index
    %154 = vector.load %arg6[%c7_123, %c0_124, %c0_125] : memref<9x1x128xf32, #tpu.memory_space<vmem>>, vector<1x1x128xf32>
    %155 = vector.shape_cast %154 : vector<1x1x128xf32> to vector<1x128xf32>
    %156 = vector.shape_cast %155 : vector<1x128xf32> to vector<1x1x128xf32>
    %157 = vector.broadcast %156 : vector<1x1x128xf32> to vector<8x8x128xf32>
    %158 = arith.mulf %153, %157 : vector<8x8x128xf32>
    %159 = arith.addf %152, %158 : vector<8x8x128xf32>
    %c2_126 = arith.constant 2 : index
    %c9_127 = arith.constant 9 : index
    %c0_128 = arith.constant 0 : index
    %160 = vector.load %arg13[%c2_126, %c9_127, %c0_128] : memref<10x24x128xf32, #tpu.memory_space<vmem>>, vector<8x8x128xf32>
    %c8_129 = arith.constant 8 : index
    %c0_130 = arith.constant 0 : index
    %c0_131 = arith.constant 0 : index
    %161 = vector.load %arg6[%c8_129, %c0_130, %c0_131] : memref<9x1x128xf32, #tpu.memory_space<vmem>>, vector<1x1x128xf32>
    %162 = vector.shape_cast %161 : vector<1x1x128xf32> to vector<1x128xf32>
    %163 = vector.shape_cast %162 : vector<1x128xf32> to vector<1x1x128xf32>
    %164 = vector.broadcast %163 : vector<1x1x128xf32> to vector<8x8x128xf32>
    %165 = arith.mulf %160, %164 : vector<8x8x128xf32>
    %166 = arith.addf %159, %165 : vector<8x8x128xf32>
    %c0_132 = arith.constant 0 : index
    %c0_133 = arith.constant 0 : index
    %c0_134 = arith.constant 0 : index
    %167 = vector.load %arg7[%c0_132, %c0_133, %c0_134] : memref<2x1x128xf32, #tpu.memory_space<vmem>>, vector<1x1x128xf32>
    %168 = vector.shape_cast %167 : vector<1x1x128xf32> to vector<1x128xf32>
    %169 = vector.shape_cast %168 : vector<1x128xf32> to vector<1x1x128xf32>
    %170 = vector.broadcast %169 : vector<1x1x128xf32> to vector<8x8x128xf32>
    %171 = arith.mulf %166, %170 : vector<8x8x128xf32>
    %c1_135 = arith.constant 1 : index
    %c0_136 = arith.constant 0 : index
    %c0_137 = arith.constant 0 : index
    %172 = vector.load %arg7[%c1_135, %c0_136, %c0_137] : memref<2x1x128xf32, #tpu.memory_space<vmem>>, vector<1x1x128xf32>
    %173 = vector.shape_cast %172 : vector<1x1x128xf32> to vector<1x128xf32>
    %174 = vector.shape_cast %173 : vector<1x128xf32> to vector<1x1x128xf32>
    %175 = vector.broadcast %174 : vector<1x1x128xf32> to vector<8x8x128xf32>
    %176 = arith.addf %171, %175 : vector<8x8x128xf32>
    %cst_138 = arith.constant 0.000000e+00 : f32
    %cst_139 = arith.constant 6.000000e+00 : f32
    %177 = vector.broadcast %cst_138 : f32 to vector<8x8x128xf32>
    %178 = arith.maximumf %177, %176 : vector<8x8x128xf32>
    %179 = vector.broadcast %cst_139 : f32 to vector<8x8x128xf32>
    %180 = arith.minimumf %179, %178 : vector<8x8x128xf32>
    %181 = vector.shape_cast %180 : vector<8x8x128xf32> to vector<64x128xf32>
    %182 = arith.truncf %181 : vector<64x128xf32> to vector<64x128xbf16>
    %c0_140 = arith.constant 0 : index
    %c0_141 = arith.constant 0 : index
    %183 = vector.load %arg8[%c0_140, %c0_141] : memref<128x128xbf16, #tpu.memory_space<vmem>>, vector<128x128xbf16>
    %cst_142 = arith.constant dense<0.000000e+00> : vector<64x128xf32>
    %184 = tpu.matmul %182, %183, %cst_142 {dimension_numbers = #tpu.dot_dimension_numbers<[1], [0], [0], [1], [0, 0, 1, 1], [], []>} : vector<64x128xbf16>, vector<128x128xbf16>, vector<64x128xf32> -> vector<64x128xf32>
    %c0_143 = arith.constant 0 : index
    %c0_144 = arith.constant 0 : index
    %c0_145 = arith.constant 0 : index
    %185 = vector.load %arg9[%c0_143, %c0_144, %c0_145] : memref<2x1x128xf32, #tpu.memory_space<vmem>>, vector<1x1x128xf32>
    %186 = vector.shape_cast %185 : vector<1x1x128xf32> to vector<1x128xf32>
    %187 = vector.broadcast %186 : vector<1x128xf32> to vector<64x128xf32>
    %188 = arith.mulf %184, %187 : vector<64x128xf32>
    %c1_146 = arith.constant 1 : index
    %c0_147 = arith.constant 0 : index
    %c0_148 = arith.constant 0 : index
    %189 = vector.load %arg9[%c1_146, %c0_147, %c0_148] : memref<2x1x128xf32, #tpu.memory_space<vmem>>, vector<1x1x128xf32>
    %190 = vector.shape_cast %189 : vector<1x1x128xf32> to vector<1x128xf32>
    %191 = vector.broadcast %190 : vector<1x128xf32> to vector<64x128xf32>
    %192 = arith.addf %188, %191 : vector<64x128xf32>
    %cst_149 = arith.constant 0.000000e+00 : f32
    %cst_150 = arith.constant 6.000000e+00 : f32
    %193 = vector.broadcast %cst_149 : f32 to vector<64x128xf32>
    %194 = arith.maximumf %193, %192 : vector<64x128xf32>
    %195 = vector.broadcast %cst_150 : f32 to vector<64x128xf32>
    %196 = arith.minimumf %195, %194 : vector<64x128xf32>
    %197 = arith.addf %100, %196 : vector<64x128xf32>
    %198 = vector.shape_cast %197 : vector<64x128xf32> to vector<8x8x128xf32>
    %c1_151 = arith.constant 1 : index
    %c8_152 = arith.constant 8 : index
    %c0_153 = arith.constant 0 : index
    %199 = vector.load %arg13[%c1_151, %c8_152, %c0_153] : memref<10x24x128xf32, #tpu.memory_space<vmem>>, vector<8x8x128xf32>
    tpu.vector_store %arg13[%c1_151, %c8_152, %c0_153], %198 {strides = array<i32>} : memref<10x24x128xf32, #tpu.memory_space<vmem>>, vector<8x8x128xf32>,
    %cst_154 = arith.constant 0.000000e+00 : f32
    %200 = vector.broadcast %cst_154 : f32 to vector<64x128xf32>
    %c0_155 = arith.constant 0 : index
    %c7_156 = arith.constant 7 : index
    %c0_157 = arith.constant 0 : index
    %201 = vector.load %arg13[%c0_155, %c7_156, %c0_157] : memref<10x24x128xf32, #tpu.memory_space<vmem>>, vector<8x8x128xf32>
    %202 = vector.shape_cast %201 : vector<8x8x128xf32> to vector<64x128xf32>
    %203 = arith.truncf %202 : vector<64x128xf32> to vector<64x128xbf16>
    %c0_158 = arith.constant 0 : index
    %c0_159 = arith.constant 0 : index
    %c0_160 = arith.constant 0 : index
    %204 = vector.load %arg10[%c0_158, %c0_159, %c0_160] : memref<9x128x128xbf16, #tpu.memory_space<vmem>>, vector<1x128x128xbf16>
    %205 = vector.shape_cast %204 : vector<1x128x128xbf16> to vector<128x128xbf16>
    %cst_161 = arith.constant dense<0.000000e+00> : vector<64x128xf32>
    %206 = tpu.matmul %203, %205, %cst_161 {dimension_numbers = #tpu.dot_dimension_numbers<[1], [0], [0], [1], [0, 0, 1, 1], [], []>} : vector<64x128xbf16>, vector<128x128xbf16>, vector<64x128xf32> -> vector<64x128xf32>
    %207 = arith.addf %200, %206 : vector<64x128xf32>
    %c0_162 = arith.constant 0 : index
    %c8_163 = arith.constant 8 : index
    %c0_164 = arith.constant 0 : index
    %208 = vector.load %arg13[%c0_162, %c8_163, %c0_164] : memref<10x24x128xf32, #tpu.memory_space<vmem>>, vector<8x8x128xf32>
    %209 = vector.shape_cast %208 : vector<8x8x128xf32> to vector<64x128xf32>
    %210 = arith.truncf %209 : vector<64x128xf32> to vector<64x128xbf16>
    %c1_165 = arith.constant 1 : index
    %c0_166 = arith.constant 0 : index
    %c0_167 = arith.constant 0 : index
    %211 = vector.load %arg10[%c1_165, %c0_166, %c0_167] : memref<9x128x128xbf16, #tpu.memory_space<vmem>>, vector<1x128x128xbf16>
    %212 = vector.shape_cast %211 : vector<1x128x128xbf16> to vector<128x128xbf16>
    %cst_168 = arith.constant dense<0.000000e+00> : vector<64x128xf32>
    %213 = tpu.matmul %210, %212, %cst_168 {dimension_numbers = #tpu.dot_dimension_numbers<[1], [0], [0], [1], [0, 0, 1, 1], [], []>} : vector<64x128xbf16>, vector<128x128xbf16>, vector<64x128xf32> -> vector<64x128xf32>
    %214 = arith.addf %207, %213 : vector<64x128xf32>
    %c0_169 = arith.constant 0 : index
    %c9_170 = arith.constant 9 : index
    %c0_171 = arith.constant 0 : index
    %215 = vector.load %arg13[%c0_169, %c9_170, %c0_171] : memref<10x24x128xf32, #tpu.memory_space<vmem>>, vector<8x8x128xf32>
    %216 = vector.shape_cast %215 : vector<8x8x128xf32> to vector<64x128xf32>
    %217 = arith.truncf %216 : vector<64x128xf32> to vector<64x128xbf16>
    %c2_172 = arith.constant 2 : index
    %c0_173 = arith.constant 0 : index
    %c0_174 = arith.constant 0 : index
    %218 = vector.load %arg10[%c2_172, %c0_173, %c0_174] : memref<9x128x128xbf16, #tpu.memory_space<vmem>>, vector<1x128x128xbf16>
    %219 = vector.shape_cast %218 : vector<1x128x128xbf16> to vector<128x128xbf16>
    %cst_175 = arith.constant dense<0.000000e+00> : vector<64x128xf32>
    %220 = tpu.matmul %217, %219, %cst_175 {dimension_numbers = #tpu.dot_dimension_numbers<[1], [0], [0], [1], [0, 0, 1, 1], [], []>} : vector<64x128xbf16>, vector<128x128xbf16>, vector<64x128xf32> -> vector<64x128xf32>
    %221 = arith.addf %214, %220 : vector<64x128xf32>
    %c1_176 = arith.constant 1 : index
    %c7_177 = arith.constant 7 : index
    %c0_178 = arith.constant 0 : index
    %222 = vector.load %arg13[%c1_176, %c7_177, %c0_178] : memref<10x24x128xf32, #tpu.memory_space<vmem>>, vector<8x8x128xf32>
    %223 = vector.shape_cast %222 : vector<8x8x128xf32> to vector<64x128xf32>
    %224 = arith.truncf %223 : vector<64x128xf32> to vector<64x128xbf16>
    %c3_179 = arith.constant 3 : index
    %c0_180 = arith.constant 0 : index
    %c0_181 = arith.constant 0 : index
    %225 = vector.load %arg10[%c3_179, %c0_180, %c0_181] : memref<9x128x128xbf16, #tpu.memory_space<vmem>>, vector<1x128x128xbf16>
    %226 = vector.shape_cast %225 : vector<1x128x128xbf16> to vector<128x128xbf16>
    %cst_182 = arith.constant dense<0.000000e+00> : vector<64x128xf32>
    %227 = tpu.matmul %224, %226, %cst_182 {dimension_numbers = #tpu.dot_dimension_numbers<[1], [0], [0], [1], [0, 0, 1, 1], [], []>} : vector<64x128xbf16>, vector<128x128xbf16>, vector<64x128xf32> -> vector<64x128xf32>
    %228 = arith.addf %221, %227 : vector<64x128xf32>
    %c1_183 = arith.constant 1 : index
    %c8_184 = arith.constant 8 : index
    %c0_185 = arith.constant 0 : index
    %229 = vector.load %arg13[%c1_183, %c8_184, %c0_185] : memref<10x24x128xf32, #tpu.memory_space<vmem>>, vector<8x8x128xf32>
    %230 = vector.shape_cast %229 : vector<8x8x128xf32> to vector<64x128xf32>
    %231 = arith.truncf %230 : vector<64x128xf32> to vector<64x128xbf16>
    %c4_186 = arith.constant 4 : index
    %c0_187 = arith.constant 0 : index
    %c0_188 = arith.constant 0 : index
    %232 = vector.load %arg10[%c4_186, %c0_187, %c0_188] : memref<9x128x128xbf16, #tpu.memory_space<vmem>>, vector<1x128x128xbf16>
    %233 = vector.shape_cast %232 : vector<1x128x128xbf16> to vector<128x128xbf16>
    %cst_189 = arith.constant dense<0.000000e+00> : vector<64x128xf32>
    %234 = tpu.matmul %231, %233, %cst_189 {dimension_numbers = #tpu.dot_dimension_numbers<[1], [0], [0], [1], [0, 0, 1, 1], [], []>} : vector<64x128xbf16>, vector<128x128xbf16>, vector<64x128xf32> -> vector<64x128xf32>
    %235 = arith.addf %228, %234 : vector<64x128xf32>
    %c1_190 = arith.constant 1 : index
    %c9_191 = arith.constant 9 : index
    %c0_192 = arith.constant 0 : index
    %236 = vector.load %arg13[%c1_190, %c9_191, %c0_192] : memref<10x24x128xf32, #tpu.memory_space<vmem>>, vector<8x8x128xf32>
    %237 = vector.shape_cast %236 : vector<8x8x128xf32> to vector<64x128xf32>
    %238 = arith.truncf %237 : vector<64x128xf32> to vector<64x128xbf16>
    %c5_193 = arith.constant 5 : index
    %c0_194 = arith.constant 0 : index
    %c0_195 = arith.constant 0 : index
    %239 = vector.load %arg10[%c5_193, %c0_194, %c0_195] : memref<9x128x128xbf16, #tpu.memory_space<vmem>>, vector<1x128x128xbf16>
    %240 = vector.shape_cast %239 : vector<1x128x128xbf16> to vector<128x128xbf16>
    %cst_196 = arith.constant dense<0.000000e+00> : vector<64x128xf32>
    %241 = tpu.matmul %238, %240, %cst_196 {dimension_numbers = #tpu.dot_dimension_numbers<[1], [0], [0], [1], [0, 0, 1, 1], [], []>} : vector<64x128xbf16>, vector<128x128xbf16>, vector<64x128xf32> -> vector<64x128xf32>
    %242 = arith.addf %235, %241 : vector<64x128xf32>
    %c2_197 = arith.constant 2 : index
    %c7_198 = arith.constant 7 : index
    %c0_199 = arith.constant 0 : index
    %243 = vector.load %arg13[%c2_197, %c7_198, %c0_199] : memref<10x24x128xf32, #tpu.memory_space<vmem>>, vector<8x8x128xf32>
    %244 = vector.shape_cast %243 : vector<8x8x128xf32> to vector<64x128xf32>
    %245 = arith.truncf %244 : vector<64x128xf32> to vector<64x128xbf16>
    %c6_200 = arith.constant 6 : index
    %c0_201 = arith.constant 0 : index
    %c0_202 = arith.constant 0 : index
    %246 = vector.load %arg10[%c6_200, %c0_201, %c0_202] : memref<9x128x128xbf16, #tpu.memory_space<vmem>>, vector<1x128x128xbf16>
    %247 = vector.shape_cast %246 : vector<1x128x128xbf16> to vector<128x128xbf16>
    %cst_203 = arith.constant dense<0.000000e+00> : vector<64x128xf32>
    %248 = tpu.matmul %245, %247, %cst_203 {dimension_numbers = #tpu.dot_dimension_numbers<[1], [0], [0], [1], [0, 0, 1, 1], [], []>} : vector<64x128xbf16>, vector<128x128xbf16>, vector<64x128xf32> -> vector<64x128xf32>
    %249 = arith.addf %242, %248 : vector<64x128xf32>
    %c2_204 = arith.constant 2 : index
    %c8_205 = arith.constant 8 : index
    %c0_206 = arith.constant 0 : index
    %250 = vector.load %arg13[%c2_204, %c8_205, %c0_206] : memref<10x24x128xf32, #tpu.memory_space<vmem>>, vector<8x8x128xf32>
    %251 = vector.shape_cast %250 : vector<8x8x128xf32> to vector<64x128xf32>
    %252 = arith.truncf %251 : vector<64x128xf32> to vector<64x128xbf16>
    %c7_207 = arith.constant 7 : index
    %c0_208 = arith.constant 0 : index
    %c0_209 = arith.constant 0 : index
    %253 = vector.load %arg10[%c7_207, %c0_208, %c0_209] : memref<9x128x128xbf16, #tpu.memory_space<vmem>>, vector<1x128x128xbf16>
    %254 = vector.shape_cast %253 : vector<1x128x128xbf16> to vector<128x128xbf16>
    %cst_210 = arith.constant dense<0.000000e+00> : vector<64x128xf32>
    %255 = tpu.matmul %252, %254, %cst_210 {dimension_numbers = #tpu.dot_dimension_numbers<[1], [0], [0], [1], [0, 0, 1, 1], [], []>} : vector<64x128xbf16>, vector<128x128xbf16>, vector<64x128xf32> -> vector<64x128xf32>
    %256 = arith.addf %249, %255 : vector<64x128xf32>
    %c2_211 = arith.constant 2 : index
    %c9_212 = arith.constant 9 : index
    %c0_213 = arith.constant 0 : index
    %257 = vector.load %arg13[%c2_211, %c9_212, %c0_213] : memref<10x24x128xf32, #tpu.memory_space<vmem>>, vector<8x8x128xf32>
    %258 = vector.shape_cast %257 : vector<8x8x128xf32> to vector<64x128xf32>
    %259 = arith.truncf %258 : vector<64x128xf32> to vector<64x128xbf16>
    %c8_214 = arith.constant 8 : index
    %c0_215 = arith.constant 0 : index
    %c0_216 = arith.constant 0 : index
    %260 = vector.load %arg10[%c8_214, %c0_215, %c0_216] : memref<9x128x128xbf16, #tpu.memory_space<vmem>>, vector<1x128x128xbf16>
    %261 = vector.shape_cast %260 : vector<1x128x128xbf16> to vector<128x128xbf16>
    %cst_217 = arith.constant dense<0.000000e+00> : vector<64x128xf32>
    %262 = tpu.matmul %259, %261, %cst_217 {dimension_numbers = #tpu.dot_dimension_numbers<[1], [0], [0], [1], [0, 0, 1, 1], [], []>} : vector<64x128xbf16>, vector<128x128xbf16>, vector<64x128xf32> -> vector<64x128xf32>
    %263 = arith.addf %256, %262 : vector<64x128xf32>
    %c0_218 = arith.constant 0 : index
    %c0_219 = arith.constant 0 : index
    %c0_220 = arith.constant 0 : index
    %264 = vector.load %arg11[%c0_218, %c0_219, %c0_220] : memref<2x1x128xf32, #tpu.memory_space<vmem>>, vector<1x1x128xf32>
    %265 = vector.shape_cast %264 : vector<1x1x128xf32> to vector<1x128xf32>
    %266 = vector.broadcast %265 : vector<1x128xf32> to vector<64x128xf32>
    %267 = arith.mulf %263, %266 : vector<64x128xf32>
    %c1_221 = arith.constant 1 : index
    %c0_222 = arith.constant 0 : index
    %c0_223 = arith.constant 0 : index
    %268 = vector.load %arg11[%c1_221, %c0_222, %c0_223] : memref<2x1x128xf32, #tpu.memory_space<vmem>>, vector<1x1x128xf32>
    %269 = vector.shape_cast %268 : vector<1x1x128xf32> to vector<1x128xf32>
    %270 = vector.broadcast %269 : vector<1x128xf32> to vector<64x128xf32>
    %271 = arith.addf %267, %270 : vector<64x128xf32>
    %272 = vector.shape_cast %271 : vector<64x128xf32> to vector<8x8x128xf32>
    %c0_224 = arith.constant 0 : index
    %c0_225 = arith.constant 0 : index
    %c0_226 = arith.constant 0 : index
    %c0_227 = arith.constant 0 : index
    %273 = vector.load %arg12[%c0_224, %c0_225, %c0_226, %c0_227] : memref<1x8x8x128xf32, #tpu.memory_space<vmem>>, vector<1x8x8x128xf32>
    %274 = vector.shape_cast %273 : vector<1x8x8x128xf32> to vector<8x8x128xf32>
    %275 = vector.shape_cast %272 : vector<8x8x128xf32> to vector<1x8x8x128xf32>
    tpu.vector_store %arg12[%c0_224, %c0_225, %c0_226, %c0_227], %275 {strides = array<i32>} : memref<1x8x8x128xf32, #tpu.memory_space<vmem>>, vector<1x8x8x128xf32>,
    return
  }
  func.func @transform_0(%arg0: i32) -> (i32, i32, i32, i32) {
    %c0_i32 = arith.constant 0 : i32
    %c0_i32_0 = arith.constant 0 : i32
    %c0_i32_1 = arith.constant 0 : i32
    %c0_i32_2 = arith.constant 0 : i32
    return %arg0, %c0_i32, %c0_i32_0, %c0_i32_1 : i32, i32, i32, i32
  }
  func.func @transform_1(%arg0: i32) -> (i32, i32, i32) {
    %c0_i32 = arith.constant 0 : i32
    %c0_i32_0 = arith.constant 0 : i32
    %c0_i32_1 = arith.constant 0 : i32
    %c0_i32_2 = arith.constant 0 : i32
    return %c0_i32, %c0_i32_0, %c0_i32_1 : i32, i32, i32
  }
  func.func @transform_2(%arg0: i32) -> (i32, i32, i32) {
    %c0_i32 = arith.constant 0 : i32
    %c0_i32_0 = arith.constant 0 : i32
    %c0_i32_1 = arith.constant 0 : i32
    %c0_i32_2 = arith.constant 0 : i32
    return %c0_i32, %c0_i32_0, %c0_i32_1 : i32, i32, i32
  }
  func.func @transform_3(%arg0: i32) -> (i32, i32) {
    %c0_i32 = arith.constant 0 : i32
    %c0_i32_0 = arith.constant 0 : i32
    %c0_i32_1 = arith.constant 0 : i32
    return %c0_i32, %c0_i32_0 : i32, i32
  }
  func.func @transform_4(%arg0: i32) -> (i32, i32, i32) {
    %c0_i32 = arith.constant 0 : i32
    %c0_i32_0 = arith.constant 0 : i32
    %c0_i32_1 = arith.constant 0 : i32
    %c0_i32_2 = arith.constant 0 : i32
    return %c0_i32, %c0_i32_0, %c0_i32_1 : i32, i32, i32
  }
  func.func @transform_5(%arg0: i32) -> (i32, i32, i32) {
    %c0_i32 = arith.constant 0 : i32
    %c0_i32_0 = arith.constant 0 : i32
    %c0_i32_1 = arith.constant 0 : i32
    %c0_i32_2 = arith.constant 0 : i32
    return %c0_i32, %c0_i32_0, %c0_i32_1 : i32, i32, i32
  }
  func.func @transform_6(%arg0: i32) -> (i32, i32, i32) {
    %c0_i32 = arith.constant 0 : i32
    %c0_i32_0 = arith.constant 0 : i32
    %c0_i32_1 = arith.constant 0 : i32
    %c0_i32_2 = arith.constant 0 : i32
    return %c0_i32, %c0_i32_0, %c0_i32_1 : i32, i32, i32
  }
  func.func @transform_7(%arg0: i32) -> (i32, i32) {
    %c0_i32 = arith.constant 0 : i32
    %c0_i32_0 = arith.constant 0 : i32
    %c0_i32_1 = arith.constant 0 : i32
    return %c0_i32, %c0_i32_0 : i32, i32
  }
  func.func @transform_8(%arg0: i32) -> (i32, i32, i32) {
    %c0_i32 = arith.constant 0 : i32
    %c0_i32_0 = arith.constant 0 : i32
    %c0_i32_1 = arith.constant 0 : i32
    %c0_i32_2 = arith.constant 0 : i32
    return %c0_i32, %c0_i32_0, %c0_i32_1 : i32, i32, i32
  }
  func.func @transform_9(%arg0: i32) -> (i32, i32, i32) {
    %c0_i32 = arith.constant 0 : i32
    %c0_i32_0 = arith.constant 0 : i32
    %c0_i32_1 = arith.constant 0 : i32
    %c0_i32_2 = arith.constant 0 : i32
    return %c0_i32, %c0_i32_0, %c0_i32_1 : i32, i32, i32
  }
  func.func @transform_10(%arg0: i32) -> (i32, i32, i32) {
    %c0_i32 = arith.constant 0 : i32
    %c0_i32_0 = arith.constant 0 : i32
    %c0_i32_1 = arith.constant 0 : i32
    %c0_i32_2 = arith.constant 0 : i32
    return %c0_i32, %c0_i32_0, %c0_i32_1 : i32, i32, i32
  }
  func.func @transform_11(%arg0: i32) -> (i32, i32, i32, i32) {
    %c0_i32 = arith.constant 0 : i32
    %c0_i32_0 = arith.constant 0 : i32
    %c0_i32_1 = arith.constant 0 : i32
    %c0_i32_2 = arith.constant 0 : i32
    return %arg0, %c0_i32, %c0_i32_0, %c0_i32_1 : i32, i32, i32, i32
  }
}

</mosaic_0001>

<bundles_post_ra>
// kernel: _forward.1
= control target key start
LH: loop header
LB: loop body
LE: loop exit
PB: predicated region body
PF: predicated region fallthrough
CT: control target
= control target key end

     0   :  { %s3844_s17 = smov 0   ;;  %s4828_s0 = inlined_call_operand.vmem [shape: f32[2,8,8,128], index: 0, kind: input, shape index: {}]   ;;  %s4829_s1 = inlined_call_operand.vmem [shape: f32[9,1,128], index: 1, kind: input, shape index: {}]   ;;  %s4830_s2 = inlined_call_operand.vmem [shape: f32[2,1,128], index: 2, kind: input, shape index: {}]   ;;  %s4831_s3 = inlined_call_operand.vmem [shape: bf16[128,128], index: 3, kind: input, shape index: {}]   ;;  %s4832_s4 = inlined_call_operand.vmem [shape: f32[2,1,128], index: 4, kind: input, shape index: {}]   ;;  %s4833_s5 = inlined_call_operand.vmem [shape: f32[9,1,128], index: 5, kind: input, shape index: {}]   ;;  %s4834_s6 = inlined_call_operand.vmem [shape: f32[2,1,128], index: 6, kind: input, shape index: {}]   ;;  %s4835_s7 = inlined_call_operand.vmem [shape: bf16[128,128], index: 7, kind: input, shape index: {}]   ;;  %s4836_s8 = inlined_call_operand.vmem [shape: f32[2,1,128], index: 8, kind: input, shape index: {}]   ;;  %s4837_s9 = inlined_call_operand.vmem [shape: bf16[9,128,128], index: 9, kind: input, shape index: {}]   ;;  %s4838_s10 = inlined_call_operand.vmem [shape: f32[2,1,128], index: 10, kind: input, shape index: {}]   ;;  %s4839_s11 = inlined_call_operand.vmem [shape: f32[2,8,8,128], index: 11, kind: output, shape index: {}]  }
   0x1 LB: > { %s2923_s18 = sadd.s32 4294967295, %s3781_s17   ;;  %p2927_p0 = scmp.ge.s32.totalorder %s3781_s17, 1  ;;  %s3781_s17 = sphi %s3844_s17, %s21_s17  }
   0x2   : > { %p337_p1 = scmp.lt.s32.totalorder %s3781_s17, 3 }
   0x4   : > { %p338_p2 = pnand %p2927_p0, %p337_p1 }
   0x6   : > { %341 = sbr.rel (%p338_p2) target bundleno = 950 (0x3b6), region = 64 }
   0xd   : > { %v3686_v0 = vld [vmem:[%s4831_s3] sm:$0xff]   ;;  %p377_p3 = scmp.lt.s32.totalorder %s2923_s18, 1  ;;  %v3687_v1 = vld [vmem:[%s4831_s3 + $0x8] sm:$0xff]   ;;  %v3783_v2 = vmov 0.0   ;;  %v3688_v3 = vld [vmem:[%s4831_s3 + $0x10] sm:$0xff]  }
   0xe   : > { %3333 = vmatprep.subr.bf16.mxu1 %v3686_v0  ;;  %388 = vst [vmem:[#allocation2] sm:$0xff] %v3783_v2  ;;  %389 = vst [vmem:[#allocation2 + $0x8] sm:$0xff] %v3783_v2  ;;  %v3689_v4 = vld [vmem:[%s4831_s3 + $0x18] sm:$0xff]   ;;  %v3891_v9 = vld [vmem:[%s4829_s1] ss:$0 sm:$0xff] }
   0xf   : > { %s4850_s18 = smov (!%p377_p3, %s2923_s18), 1  ;;  %390 = vst [vmem:[#allocation2 + $0x10] sm:$0xff] %v3783_v2  ;;  %391 = vst [vmem:[#allocation2 + $0x18] sm:$0xff] %v3783_v2  ;;  %3334 = vmatpush3.bf16.msra.mxu1 %v3686_v0  ;;  %v2934_v10 = vld [vmem:[%s4829_s1 + $0x1] ss:$0 sm:$0xff]  ;;  %v3691_v32 = vld [vmem:[%s4831_s3 + $0x28] sm:$0xff]  }
  0x10   : > { %393 = vst [vmem:[#allocation2 + $0x28] sm:$0xff] %v3783_v2  ;;  %394 = vst [vmem:[#allocation2 + $0x30] sm:$0xff] %v3783_v2  ;;  %3335 = vmatprep.subr.bf16.mxu1 %v3687_v1  ;;  %s3199_s25 = sshll.u32 %s4850_s18, 6  ;;  %v482_v12 = vmul.f32 0.0, %v2934_v10  ;;  %v3903_v14 = vld [vmem:[%s4829_s1 + $0x2] ss:$0 sm:$0xff] }
  0x11   : > { %396 = vst [vmem:[#allocation2 + $0x40] sm:$0xff] %v3783_v2  ;;  %397 = vst [vmem:[#allocation2 + $0x48] sm:$0xff] %v3783_v2  ;;  %s3869_s28 = scalar_lea.vmem %s4828_s0, %s3199_s25  ;;  %v3911_v17 = vld [vmem:[%s4829_s1 + $0x4] ss:$0 sm:$0xff]  ;;  %v3919_v20 = vld [vmem:[%s4829_s1 + $0x3] ss:$0 sm:$0xff]  ;;  %s4815_s15 = scalar_lea.vmem %s4839_s11, %s3199_s25 }
  0x12   : > { %399 = vst [vmem:[#allocation2 + $0x58] sm:$0xff] %v3783_v2  ;;  %400 = vst [vmem:[#allocation2 + $0x60] sm:$0xff] %v3783_v2  ;;  %v3875_v5 = vld [vmem:[%s3869_s28] sm:$0xff]  ;;  %v3878_v6 = vld [vmem:[%s3869_s28 + $0x8] sm:$0xff] }
  0x13   : > { %402 = vst [vmem:[#allocation2 + $0x70] sm:$0xff] %v3783_v2  ;;  %403 = vst [vmem:[#allocation2 + $0x78] sm:$0xff] %v3783_v2  ;;  %3336 = vmatpush3.bf16.msra.mxu1 %v3687_v1  ;;  %v3881_v7 = vld [vmem:[%s3869_s28 + $0x10] sm:$0xff]  ;;  %v483_v15 = vmul.f32 %v2934_v10, %v3875_v5  ;;  %v3690_v18 = vld [vmem:[%s4831_s3 + $0x20] sm:$0xff]   ;;  %v578_v21 = vmul.f32 %v3911_v17, %v3875_v5  ;;  %v3929_v23 = vmul.f32 %v2934_v10, %v3878_v6 }
  0x14   : > { %405 = vst [vmem:[#allocation2 + $0x88] sm:$0xff] %v3783_v2  ;;  %406 = vst [vmem:[#allocation2 + $0x90] sm:$0xff] %v3783_v2  ;;  %3337 = vmatprep.subr.bf16.mxu1 %v3688_v3  ;;  %v3926_v22 = vld [vmem:[%s4829_s1 + $0x7] ss:$0 sm:$0xff]  ;;  %v3932_v24 = vmul.f32 %v2934_v10, %v3881_v7  ;;  %v3936_v25 = vmul.f32 %v3911_v17, %v3878_v6  ;;  %v3941_v26 = vld [vmem:[%s4829_s1 + $0x5] ss:$0 sm:$0xff]  ;;  %v3959_v31 = vmul.f32 %v3911_v17, %v3881_v7 }
  0x15   : > { %408 = vst [vmem:[#allocation2 + $0xa0] sm:$0xff] %v3783_v2  ;;  %409 = vst [vmem:[#allocation2 + $0xa8] sm:$0xff] %v3783_v2  ;;  %v3886_v8 = vld [vmem:[#allocation2 + $0x7] sm:$0xff]  ;;  %v3945_v27 = vmul.f32 %v3926_v22, %v3878_v6  ;;  %v3949_v28 = vmul.f32 %v3926_v22, %v3881_v7  ;;  %v3952_v29 = vld [vmem:[%s3869_s28 + $0x18] sm:$0xff] }
  0x16   : > { %411 = vst [vmem:[#allocation2 + $0xb8] sm:$0xff] %v3783_v2  ;;  %412 = vst [vmem:[#allocation2 + $0xc0] sm:$0xff] %v3783_v2  ;;  %v450_v11 = vmul.f32 %v3891_v9, %v3886_v8  ;;  %v3898_v13 = vld [vmem:[#allocation2 + $0x9] sm:$0xff]  ;;  %v3955_v30 = vld [vmem:[%s3869_s28 + $0x20] sm:$0xff]  ;;  %v3968_v34 = vmul.f32 %v3911_v17, %v3952_v29  ;;  %v3972_v35 = vmul.f32 %v3926_v22, %v3952_v29 }
  0x17   : > { %414 = vst [vmem:[#allocation2 + $0xd0] sm:$0xff] %v3783_v2  ;;  %415 = vst [vmem:[#allocation2 + $0xd8] sm:$0xff] %v3783_v2  ;;  %3338 = vmatpush3.bf16.msra.mxu1 %v3688_v3  ;;  %v514_v16 = vmul.f32 %v3903_v14, %v3898_v13  ;;  %v3976_v36 = vmul.f32 %v3926_v22, %v3955_v30  ;;  %v3979_v37 = vld [vmem:[%s3869_s28 + $0x28] sm:$0xff]  ;;  %v3982_v38 = vld [vmem:[%s3869_s28 + $0x30] sm:$0xff]  ;;  %v4000_v42 = vmul.f32 %v2934_v10, %v3952_v29 }
  0x18   : > { %416 = vst [vmem:[#allocation2 + $0xe0] sm:$0xff] %v3783_v2  ;;  %417 = vst [vmem:[#allocation2 + $0xe8] sm:$0xff] %v3783_v2  ;;  %3339 = vmatprep.subr.bf16.mxu1 %v3689_v4  ;;  %v490_v19 = vadd.f32 %v482_v12, %v450_v11  ;;  %v3985_v39 = vld [vmem:[%s3869_s28 + $0x38] sm:$0xff]  ;;  %v3990_v40 = vld [vmem:[%s4829_s1 + $0x6] ss:$0 sm:$0xff]  ;;  %v4003_v43 = vmul.f32 %v2934_v10, %v3955_v30  ;;  %v4007_v44 = vmul.f32 %v3911_v17, %v3955_v30 }
  0x19   : > { %427 = vst [vmem:[#allocation2 + $0x20] sm:$0xff] %v3875_v5  ;;  %428 = vst [vmem:[#allocation2 + $0x38] sm:$0xff] %v3878_v6  ;;  %v3995_v41 = vld [vmem:[%s4829_s1 + $0x8] ss:$0 sm:$0xff]  ;;  %v4011_v45 = vmul.f32 %v3911_v17, %v3979_v37  ;;  %v4016_v49 = vmul.f32 %v3926_v22, %v3979_v37  ;;  %v4020_v50 = vmul.f32 %v3926_v22, %v3982_v38  ;;  %v3692_v60 = vld [vmem:[%s4831_s3 + $0x30] sm:$0xff]  }
  0x1a   : > { %429 = vst [vmem:[#allocation2 + $0x50] sm:$0xff] %v3881_v7  ;;  %4843 = vst [vmem:[#allocation3_spill] sm:$0xff] %v3898_v13  ;;  %v522_v33 = vadd.f32 %v514_v16, %v490_v19  ;;  %v4023_v51 = vmul.f32 %v2934_v10, %v3979_v37  ;;  %v4026_v52 = vmul.f32 %v2934_v10, %v3982_v38 }
  0x1b   : > { %4844 = vst [vmem:[#allocation4_spill] sm:$0xff] %v3955_v30  ;;  %430 = vst [vmem:[#allocation2 + $0x68] sm:$0xff] %v3952_v29  ;;  %3340 = vmatpush3.bf16.msra.mxu1 %v3689_v4 }
  0x1c   : > { %431 = vst [vmem:[#allocation2 + $0x80] sm:$0xff] %v3955_v30  ;;  %4845 = vst [vmem:[#allocation5_spill] sm:$0xff] %v3979_v37  ;;  %3341 = vmatprep.subr.bf16.mxu1 %v3690_v18 }
  0x1d   : > { %432 = vst [vmem:[#allocation2 + $0x98] sm:$0xff] %v3979_v37  ;;  %433 = vst [vmem:[#allocation2 + $0xb0] sm:$0xff] %v3982_v38 }
  0x1e   : > { %434 = vst [vmem:[#allocation2 + $0xc8] sm:$0xff] %v3985_v39 }
  0x1f   : > { %3342 = vmatpush3.bf16.msra.mxu1 %v3690_v18 }
  0x20   : > { %v436_v46 = vld [vmem:[#allocation2 + $0x1f] sm:$0xff]  ;;  %v531_v48 = vld [vmem:[#allocation2 + $0x37] sm:$0xff]  ;;  %3343 = vmatprep.subr.bf16.mxu1 %v3691_v32 }
  0x21   : > { %v499_v47 = vld [vmem:[#allocation2 + $0x21] sm:$0xff]  ;;  %v451_v53 = vmul.f32 %v3891_v9, %v436_v46  ;;  %v546_v55 = vmul.f32 %v3919_v20, %v436_v46  ;;  %v547_v56 = vmul.f32 %v3919_v20, %v531_v48  ;;  %v595_v57 = vld [vmem:[#allocation2 + $0x39] sm:$0xff]  ;;  %v628_v58 = vld [vmem:[#allocation2 + $0x4f] sm:$0xff]  ;;  %v643_v63 = vmul.f32 %v3990_v40, %v531_v48 }
  0x22   : > { %v515_v54 = vmul.f32 %v3903_v14, %v499_v47  ;;  %v692_v59 = vld [vmem:[#allocation2 + $0x51] sm:$0xff]  ;;  %v610_v61 = vmul.f32 %v3941_v26, %v499_v47  ;;  %v611_v62 = vmul.f32 %v3941_v26, %v595_v57  ;;  %v644_v0 = vmul.f32 %v3990_v40, %v628_v58  ;;  %v533_v47 = vld [vmem:[#allocation2 + $0x67] sm:$0xff] }
  0x23   : > { %v491_v1 = vadd.f32 %v483_v15, %v451_v53  ;;  %v554_v2 = vadd.f32 %v546_v55, %v522_v33  ;;  %v707_v3 = vmul.f32 %v3995_v41, %v595_v57  ;;  %v4041_v4 = vmul.f32 %v3995_v41, %v692_v59  ;;  %v597_v18 = vld [vmem:[#allocation2 + $0x69] sm:$0xff]  ;;  %v630_v30 = vld [vmem:[#allocation2 + $0x7f] sm:$0xff]  ;;  %3344 = vmatpush3.bf16.msra.mxu1 %v3691_v32 }
  0x24   : > { %v452_v10 = vmul.f32 %v3891_v9, %v531_v48  ;;  %v453_v11 = vmul.f32 %v3891_v9, %v628_v58  ;;  %v516_v12 = vmul.f32 %v3903_v14, %v595_v57  ;;  %v517_v16 = vmul.f32 %v3903_v14, %v692_v59  ;;  %3345 = vmatprep.subr.bf16.mxu1 %v3692_v60 }
  0x25   : > { %v523_v19 = vadd.f32 %v515_v54, %v491_v1  ;;  %v586_v46 = vadd.f32 %v578_v21, %v554_v2  ;;  %v548_v15 = vmul.f32 %v3919_v20, %v628_v58  ;;  %v612_v33 = vmul.f32 %v3941_v26, %v692_v59  ;;  %v694_v58 = vld [vmem:[#allocation2 + $0x81] sm:$0xff] }
  0x26   : > { %v492_v53 = vadd.f32 %v3929_v23, %v452_v10  ;;  %v493_v55 = vadd.f32 %v3932_v24, %v453_v11  ;;  %v549_v48 = vmul.f32 %v3919_v20, %v533_v47  ;;  %v613_v37 = vmul.f32 %v3941_v26, %v597_v18  ;;  %v3693_v23 = vld [vmem:[%s4831_s3 + $0x38] sm:$0xff]  }
  0x27   : > { %v555_v57 = vadd.f32 %v547_v56, %v523_v19  ;;  %v618_v13 = vadd.f32 %v610_v61, %v586_v46  ;;  %v645_v21 = vmul.f32 %v3990_v40, %v533_v47  ;;  %v646_v54 = vmul.f32 %v3990_v40, %v630_v30  ;;  %v535_v11 = vld [vmem:[#allocation2 + $0x97] sm:$0xff]  ;;  %v4066_v19 = vld [vmem:[%s4830_s2] ss:$0 sm:$0xff]  ;;  %3346 = vmatpush3.bf16.msra.mxu1 %v3692_v60 }
  0x28   : > { %v524_v59 = vadd.f32 %v516_v12, %v492_v53  ;;  %v525_v24 = vadd.f32 %v517_v16, %v493_v55  ;;  %v709_v1 = vmul.f32 %v3995_v41, %v597_v18  ;;  %v710_v2 = vmul.f32 %v3995_v41, %v694_v58  ;;  %3347 = vmatprep.subr.bf16.mxu1 %v3693_v23 }
  0x29   : > { %v587_v32 = vadd.f32 %v3936_v25, %v555_v57  ;;  %v651_v56 = vadd.f32 %v643_v63, %v618_v13  ;;  %v454_v61 = vmul.f32 %v3891_v9, %v533_v47  ;;  %v455_v10 = vmul.f32 %v3891_v9, %v630_v30  ;;  %v599_v47 = vld [vmem:[#allocation2 + $0x99] sm:$0xff]  ;;  %v4076_v57 = vld [vmem:[%s4830_s2 + $0x1] ss:$0 sm:$0xff] }
  0x2a   : > { %v556_v46 = vadd.f32 %v548_v15, %v524_v59  ;;  %v557_v12 = vadd.f32 %v549_v48, %v525_v24  ;;  %v518_v16 = vmul.f32 %v3903_v14, %v597_v18  ;;  %v519_v53 = vmul.f32 %v3903_v14, %v694_v58 }
  0x2b   : > { %v619_v55 = vadd.f32 %v611_v62, %v587_v32  ;;  %v683_v13 = vadd.f32 %v3945_v27, %v651_v56  ;;  %v494_v25 = vadd.f32 %v4000_v42, %v454_v61  ;;  %v495_v63 = vadd.f32 %v4003_v43, %v455_v10  ;;  %v632_v43 = vld [vmem:[#allocation2 + $0xaf] sm:$0xff]  ;;  %3348 = vmatpush3.bf16.msra.mxu1 %v3693_v23 }
  0x2c   : > { %v588_v15 = vadd.f32 %v3959_v31, %v556_v46  ;;  %v589_v18 = vadd.f32 %v3968_v34, %v557_v12  ;;  %v550_v60 = vmul.f32 %v3919_v20, %v630_v30  ;;  %v551_v62 = vmul.f32 %v3919_v20, %v535_v11  ;;  %v696_v46 = vld [vmem:[#allocation2 + $0xb1] sm:$0xff] }
  0x2d   : > { %v652_v27 = vadd.f32 %v644_v0, %v619_v55  ;;  %v715_v48 = vadd.f32 %v707_v3, %v683_v13  ;;  %v526_v42 = vadd.f32 %v518_v16, %v494_v25  ;;  %v527_v59 = vadd.f32 %v519_v53, %v495_v63 }
  0x2e   : > { %v620_v24 = vadd.f32 %v612_v33, %v588_v15  ;;  %v621_v32 = vadd.f32 %v613_v37, %v589_v18  ;;  %v614_v56 = vmul.f32 %v3941_v26, %v694_v58  ;;  %v615_v61 = vmul.f32 %v3941_v26, %v599_v47 }
  0x2f   : > { %v684_v31 = vadd.f32 %v3949_v28, %v652_v27  ;;  %v730_v34 = vmul.f32 %v4066_v19, %v715_v48  ;;  %v558_v10 = vadd.f32 %v550_v60, %v526_v42  ;;  %v559_v30 = vadd.f32 %v551_v62, %v527_v59 }
  0x30   : > { %v653_v12 = vadd.f32 %v645_v21, %v620_v24  ;;  %v654_v0 = vadd.f32 %v646_v54, %v621_v32  ;;  %v647_v3 = vmul.f32 %v3990_v40, %v535_v11  ;;  %v648_v16 = vmul.f32 %v3990_v40, %v632_v43 }
  0x31   : > { %v716_v37 = vadd.f32 %v4041_v4, %v684_v31  ;;  %v746_v33 = vadd.f32 %v4076_v57, %v730_v34  ;;  %v590_v58 = vadd.f32 %v4007_v44, %v558_v10  ;;  %v591_v23 = vadd.f32 %v4011_v45, %v559_v30  ;;  %v601_v10 = vld [vmem:[#allocation2 + $0xc9] sm:$0xff] }
  0x32   : > { %v685_v28 = vadd.f32 %v3972_v35, %v653_v12  ;;  %v686_v53 = vadd.f32 %v3976_v36, %v654_v0  ;;  %v711_v55 = vmul.f32 %v3995_v41, %v599_v47  ;;  %v712_v21 = vmul.f32 %v3995_v41, %v696_v46 }
  0x33   : > { %v731_v54 = vmul.f32 %v4066_v19, %v716_v37  ;;  %v754_v13 = vmax.f32 %v746_v33, 0.0  ;;  %v622_v25 = vadd.f32 %v614_v56, %v590_v58  ;;  %v623_v63 = vadd.f32 %v615_v61, %v591_v23 }
  0x34   : > { %v717_v4 = vadd.f32 %v709_v1, %v685_v28  ;;  %v718_v15 = vadd.f32 %v710_v2, %v686_v53  ;;  %v456_v18 = vmul.f32 %v3891_v9, %v535_v11  ;;  %v457_v44 = vmul.f32 %v3891_v9, %v632_v43  ;;  %v537_v11 = vld [vmem:[#allocation2 + $0xc7] sm:$0xff] }
  0x35   : > { %v747_v45 = vadd.f32 %v4076_v57, %v731_v54  ;;  %v762_v35 = vmin.f32 %v754_v13, 6.0  ;;  %v655_v60 = vadd.f32 %v647_v3, %v622_v25  ;;  %v656_v36 = vadd.f32 %v648_v16, %v623_v63  ;;  %v4125_v25 = vld [vmem:[#allocation2 + $0xe1] sm:$0xff] }
  0x36   : > { %v732_v62 = vmul.f32 %v4066_v19, %v717_v4  ;;  %v733_v27 = vmul.f32 %v4066_v19, %v718_v15  ;;  %v496_v48 = vadd.f32 %v4023_v51, %v456_v18  ;;  %v497_v42 = vadd.f32 %v4026_v52, %v457_v44 }
  0x37   : > { %v755_v59 = vmax.f32 %v747_v45, 0.0  ;;  %v687_v1 = vadd.f32 %v4016_v49, %v655_v60  ;;  %v688_v2 = vadd.f32 %v4020_v50, %v656_v36  ;;  %v520_v9 = vmul.f32 %v3903_v14, %v599_v47  ;;  %v4112_v47 = vld [vmem:[#allocation2 + $0xdf] sm:$0xff] }
  0x38   : > { %v748_v24 = vadd.f32 %v4076_v57, %v732_v62  ;;  %v749_v32 = vadd.f32 %v4076_v57, %v733_v27  ;;  %v521_v56 = vmul.f32 %v3903_v14, %v696_v46  ;;  %v552_v61 = vmul.f32 %v3919_v20, %v632_v43 }
  0x39   : > { %v763_v31 = vmin.f32 %v755_v59, 6.0  ;;  %v719_v51 = vadd.f32 %v711_v55, %v687_v1  ;;  %v720_v34 = vadd.f32 %v712_v21, %v688_v2  ;;  %v528_v52 = vadd.f32 %v520_v9, %v496_v48 }
  0x3a   : > { %v756_v30 = vmax.f32 %v748_v24, 0.0  ;;  %v757_v49 = vmax.f32 %v749_v32, 0.0  ;;  %v529_v12 = vadd.f32 %v521_v56, %v497_v42  ;;  %v553_v50 = vmul.f32 %v3919_v20, %v537_v11 }
  0x3b   : > { %v770_v0 = vpack.c.bf16 %v763_v31, %v762_v35  ;;  %v734_v3 = vmul.f32 %v4066_v19, %v719_v51  ;;  %v735_v16 = vmul.f32 %v4066_v19, %v720_v34  ;;  %v560_v14 = vadd.f32 %v552_v61, %v528_v52  ;;  %v3697_v51 = vld [vmem:[%s4835_s7 + $0x18] sm:$0xff]   ;;  %v3698_v34 = vld [vmem:[%s4835_s7 + $0x20] sm:$0xff]   ;;  %v3699_v52 = vld [vmem:[%s4835_s7 + $0x28] sm:$0xff]  }
  0x3c   : > { %v764_v37 = vmin.f32 %v756_v30, 6.0  ;;  %v765_v43 = vmin.f32 %v757_v49, 6.0  ;;  %v561_v33 = vadd.f32 %v553_v50, %v529_v12  ;;  %v584_v58 = vmul.f32 %v3911_v17, %v3982_v38  ;;  %v3701_v30 = vld [vmem:[%s4835_s7 + $0x38] sm:$0xff]   ;;  %v4166_v49 = vld [vmem:[%s4837_s9 + $0x40] sm:$0xff]   ;;  %v3705_v50 = vld [vmem:[%s4837_s9 + $0xc8] sm:$0xff]  }
  0x3d   : > { %3349 = vmatprep.mubr.bf16.mxu1 %v770_v0  ;;  %v750_v23 = vadd.f32 %v4076_v57, %v734_v3  ;;  %v751_v28 = vadd.f32 %v4076_v57, %v735_v16  ;;  %v585_v20 = vmul.f32 %v3911_v17, %v3985_v39  ;;  %v616_v53 = vmul.f32 %v3941_v26, %v696_v46  ;;  %v3703_v12 = vld [vmem:[%s4837_s9 + $0xc0] sm:$0xff]  }
  0x3e   : > { %v771_v55 = vpack.c.bf16 %v765_v43, %v764_v37  ;;  %v592_v21 = vadd.f32 %v584_v58, %v560_v14  ;;  %v617_v54 = vmul.f32 %v3941_v26, %v601_v10  ;;  %v649_v13 = vmul.f32 %v3990_v40, %v537_v11  ;;  %3453 = vmatprep.subr.bf16.mxu0 %v3703_v12  ;;  %v4178_v0 = vld [vmem:[%s4832_s4] ss:$0 sm:$0xff]  ;;  %v4183_v16 = vld [vmem:[%s4832_s4 + $0x1] ss:$0 sm:$0xff] }
  0x3f   : > { %v758_v63 = vmax.f32 %v750_v23, 0.0  ;;  %v759_v4 = vmax.f32 %v751_v28, 0.0  ;;  %v593_v15 = vadd.f32 %v585_v20, %v561_v33  ;;  %v650_v18 = vmul.f32 %v3990_v40, %v4112_v47  ;;  %3454 = vmatpush3.bf16.msra.mxu0 %v3703_v12 }
  0x40   : > { %3350 = vmatmul.mubr.bf16.vlgmr.msra.gmra.mrb[0].mxu1 %v771_v55  ;;  %v624_v44 = vadd.f32 %v616_v53, %v592_v21  ;;  %v681_v17 = vmul.f32 %v3926_v22, %v3985_v39  ;;  %v682_v26 = vmul.f32 0.0, %v3926_v22  ;;  %v713_v36 = vmul.f32 %v3995_v41, %v601_v10  ;;  %v3700_v10 = vld [vmem:[%s4835_s7 + $0x30] sm:$0xff]   ;;  %3455 = vmatprep.subr.bf16.mxu0 %v3705_v50 }
  0x41   : > { %v766_v46 = vmin.f32 %v758_v63, 6.0  ;;  %v767_v45 = vmin.f32 %v759_v4, 6.0  ;;  %v625_v35 = vadd.f32 %v617_v54, %v593_v15  ;;  %v714_v48 = vmul.f32 %v3995_v41, %v4125_v25  ;;  %v3694_v41 = vld [vmem:[%s4835_s7] sm:$0xff]  }
  0x42   : > { %v657_v60 = vadd.f32 %v649_v13, %v624_v44  ;;  %3357 = vmatprep.subr.bf16.mxu1 %v3694_v41  ;;  %v4195_v54 = vld [vmem:[%s4833_s5] ss:$0 sm:$0xff] }
  0x43   : > { %v772_v62 = vpack.c.bf16 %v767_v45, %v766_v46  ;;  %v658_v27 = vadd.f32 %v650_v18, %v625_v35  ;;  %3358 = vmatpush3.bf16.msra.mxu1 %v3694_v41  ;;  %3456 = vmatpush3.bf16.msra.mxu0 %v3705_v50  ;;  %v4201_v18 = vld [vmem:[%s4833_s5 + $0x1] ss:$0 sm:$0xff]  ;;  %v981_v46 = vmul.f32 %v4195_v54, %v3886_v8 }
  0x44   : > { %v689_v42 = vadd.f32 %v681_v17, %v657_v60  ;;  %v1013_v45 = vmul.f32 0.0, %v4201_v18  ;;  %v4212_v60 = vld [vmem:[%s4833_s5 + $0x2] ss:$0 sm:$0xff] }
  0x45   : > { %3353 = vmatprep.mubr.bf16.mxu1 %v772_v62  ;;  %v690_v40 = vadd.f32 %v682_v26, %v658_v27 }
  0x46   : > { %v721_v59 = vadd.f32 %v713_v36, %v689_v42  ;;  %v1021_v8 = vadd.f32 %v1013_v45, %v981_v46 }
  0x47   : > { %v722_v1 = vadd.f32 %v714_v48, %v690_v40  ;;  %v4846_v48 = vld [vmem:[#allocation3_spill] sm:$0xff]  ;;  %v4242_v40 = vld [vmem:[%s4833_s5 + $0x6] ss:$0 sm:$0xff] }
  0x48   : > { %v736_v2 = vmul.f32 %v4066_v19, %v721_v59  ;;  %v1045_v42 = vmul.f32 %v4212_v60, %v4846_v48 }
  0x49   : > { %v737_v9 = vmul.f32 %v4066_v19, %v722_v1  ;;  %v3695_v19 = vld [vmem:[%s4835_s7 + $0x8] sm:$0xff]  }
  0x4a   : > { %v752_v11 = vadd.f32 %v4076_v57, %v736_v2  ;;  %3359 = vmatprep.subr.bf16.mxu1 %v3695_v19  ;;  %v4253_v2 = vld [vmem:[%s4833_s5 + $0x3] ss:$0 sm:$0xff] }
  0x4b   : > { %v753_v22 = vadd.f32 %v4076_v57, %v737_v9  ;;  %v3696_v57 = vld [vmem:[%s4835_s7 + $0x10] sm:$0xff]   ;;  %3360 = vmatpush3.bf16.msra.mxu1 %v3695_v19 }
  0x4c   : > { %v760_v24 = vmax.f32 %v752_v11, 0.0  ;;  %3361 = vmatprep.subr.bf16.mxu1 %v3696_v57 }
  0x4d   : > { %v761_v32 = vmax.f32 %v753_v22, 0.0 }
  0x4e   : > { %v768_v56 = vmin.f32 %v760_v24, 6.0 }
  0x4f   : > { %v769_v61 = vmin.f32 %v761_v32, 6.0  ;;  %3362 = vmatpush3.bf16.msra.mxu1 %v3696_v57  ;;  %v4268_v32 = vld [vmem:[%s4833_s5 + $0x5] ss:$0 sm:$0xff] }
  0x50   : > { %3363 = vmatprep.subr.bf16.mxu1 %v3697_v51 }
  0x51   : > { %v773_v31 = vpack.c.bf16 %v769_v61, %v768_v56 }
  0x53   : > { %3354 = vmatmul.mubr.bf16.gmra.mrb[4].mxu1 %v773_v31 }
  0x54   : > { %3364 = vmatpush3.bf16.msra.mxu1 %v3697_v51 }
  0x55   : > { %3365 = vmatprep.subr.bf16.mxu1 %v3698_v34 }
  0x58   : > { %3366 = vmatpush3.bf16.msra.mxu1 %v3698_v34 }
  0x59   : > { %3367 = vmatprep.subr.bf16.mxu1 %v3699_v52 }
  0x5c   : > { %3368 = vmatpush3.bf16.msra.mxu1 %v3699_v52 }
  0x5d   : > { %3369 = vmatprep.subr.bf16.mxu1 %v3700_v10 }
  0x60   : > { %3370 = vmatpush3.bf16.msra.mxu1 %v3700_v10 }
  0x61   : > { %3371 = vmatprep.subr.bf16.mxu1 %v3701_v30 }
  0x64   : > { %3372 = vmatpush3.bf16.msra.mxu1 %v3701_v30 }
  0x65   : > { %3381 = vmatprep.subr.bf16.mxu1 %v4166_v49 }
 0x113   : > { %v3351_v3 = vpop.f32.mrb[0].mxu1 }
 0x114   : > { %v912_v14 = vmul.f32 %v3351_v3, %v4178_v0  ;;  %v872_v37 = vpop.f32.mrb[1].mxu1 }
 0x115   : > { %v910_v43 = vmul.f32 %v4178_v0, %v872_v37  ;;  %v3352_v33 = vpop.f32.mrb[2].mxu1 }
 0x116   : > { %v928_v58 = vadd.f32 %v4183_v16, %v912_v14  ;;  %v913_v23 = vmul.f32 %v3352_v33, %v4178_v0  ;;  %v875_v28 = vpop.f32.mrb[3].mxu1 }
 0x117   : > { %v926_v20 = vadd.f32 %v4183_v16, %v910_v43  ;;  %v911_v53 = vmul.f32 %v4178_v0, %v875_v28 }
 0x118   : > { %v936_v55 = vmax.f32 %v928_v58, 0.0  ;;  %v929_v21 = vadd.f32 %v4183_v16, %v913_v23 }
 0x119   : > { %v934_v13 = vmax.f32 %v926_v20, 0.0  ;;  %v927_v63 = vadd.f32 %v4183_v16, %v911_v53 }
 0x11a   : > { %v944_v4 = vmin.f32 %v936_v55, 6.0  ;;  %v937_v15 = vmax.f32 %v929_v21, 0.0 }
 0x11b   : > { %v942_v44 = vmin.f32 %v934_v13, 6.0  ;;  %v935_v17 = vmax.f32 %v927_v63, 0.0 }
 0x11c   : > { %v4207_v35 = vadd.f32 %v944_v4, %v3881_v7  ;;  %v945_v26 = vmin.f32 %v937_v15, 6.0 }
 0x11d   : > { %v4215_v36 = vadd.f32 %v942_v44, %v3875_v5  ;;  %v943_v62 = vmin.f32 %v935_v17, 6.0  ;;  %v4231_v5 = vld [vmem:[%s4833_s5 + $0x7] ss:$0 sm:$0xff] }
 0x11e   : > { %960 = vst [vmem:[#allocation2 + $0x50] sm:$0xff] %v4207_v35  ;;  %v4219_v27 = vadd.f32 %v945_v26, %v3952_v29  ;;  %v4237_v29 = vld [vmem:[%s4833_s5 + $0x4] ss:$0 sm:$0xff]  ;;  %v4246_v59 = vmul.f32 %v4231_v5, %v4207_v35  ;;  %v1016_v11 = vmul.f32 %v4201_v18, %v4207_v35 }
 0x11f   : > { %958 = vst [vmem:[#allocation2 + $0x20] sm:$0xff] %v4215_v36  ;;  %v4223_v7 = vadd.f32 %v943_v62, %v3878_v6  ;;  %v1053_v6 = vadd.f32 %v1045_v42, %v1021_v8  ;;  %v1014_v1 = vmul.f32 %v4201_v18, %v4215_v36  ;;  %v1109_v9 = vmul.f32 %v4237_v29, %v4215_v36 }
 0x120   : > { %961 = vst [vmem:[#allocation2 + $0x68] sm:$0xff] %v4219_v27  ;;  %v4261_v22 = vmul.f32 %v4237_v29, %v4207_v35  ;;  %v4274_v31 = vmul.f32 %v4237_v29, %v4219_v27  ;;  %v4278_v41 = vmul.f32 %v4231_v5, %v4219_v27  ;;  %v4282_v19 = vmul.f32 %v4201_v18, %v4219_v27 }
 0x121   : > { %959 = vst [vmem:[#allocation2 + $0x38] sm:$0xff] %v4223_v7  ;;  %v1110_v24 = vmul.f32 %v4237_v29, %v4223_v7  ;;  %v1205_v10 = vmul.f32 %v4231_v5, %v4223_v7  ;;  %v1015_v12 = vmul.f32 %v4201_v18, %v4223_v7 }
 0x125   : > { %v1158_v56 = vld [vmem:[#allocation2 + $0x4f] sm:$0xff] }
 0x126   : > { %v4270_v61 = vld [vmem:[#allocation2 + $0x51] sm:$0xff]  ;;  %v3355_v57 = vpop.f32.mrb[4].mxu1  ;;  %v967_v51 = vld [vmem:[#allocation2 + $0x1f] sm:$0xff]  ;;  %v4285_v52 = vmul.f32 %v4242_v40, %v1158_v56  ;;  %v984_v30 = vmul.f32 %v4195_v54, %v1158_v56  ;;  %v1079_v15 = vmul.f32 %v4253_v2, %v1158_v56 }
 0x127   : > { %v1030_v34 = vld [vmem:[#allocation2 + $0x21] sm:$0xff]  ;;  %v916_v50 = vmul.f32 %v3355_v57, %v4178_v0  ;;  %v888_v3 = vpop.f32.mrb[5].mxu1  ;;  %v982_v14 = vmul.f32 %v4195_v54, %v967_v51  ;;  %v1077_v37 = vmul.f32 %v4253_v2, %v967_v51  ;;  %v1048_v43 = vmul.f32 %v4212_v60, %v4270_v61 }
 0x128   : > { %v914_v33 = vmul.f32 %v4178_v0, %v888_v3  ;;  %v3356_v58 = vpop.f32.mrb[6].mxu1  ;;  %v1046_v23 = vmul.f32 %v4212_v60, %v1030_v34  ;;  %v1062_v28 = vld [vmem:[#allocation2 + $0x37] sm:$0xff]  ;;  %v1141_v53 = vmul.f32 %v4268_v32, %v1030_v34  ;;  %v1024_v55 = vadd.f32 %v1016_v11, %v984_v30 }
 0x129   : > { %v1126_v20 = vld [vmem:[#allocation2 + $0x39] sm:$0xff]  ;;  %v932_v21 = vadd.f32 %v4183_v16, %v916_v50  ;;  %v917_v13 = vmul.f32 %v3356_v58, %v4178_v0  ;;  %v891_v63 = vpop.f32.mrb[7].mxu1  ;;  %v1022_v4 = vadd.f32 %v1014_v1, %v982_v14  ;;  %v1078_v46 = vmul.f32 %v4253_v2, %v1062_v28  ;;  %v1064_v14 = vld [vmem:[#allocation2 + $0x67] sm:$0xff] }
 0x12a   : > { %v930_v44 = vadd.f32 %v4183_v16, %v914_v33  ;;  %v915_v17 = vmul.f32 %v4178_v0, %v891_v63  ;;  %v1085_v45 = vadd.f32 %v1077_v37, %v1053_v6  ;;  %v1142_v48 = vmul.f32 %v4268_v32, %v1126_v20 }
 0x12b   : > { %v940_v26 = vmax.f32 %v932_v21, 0.0  ;;  %v933_v62 = vadd.f32 %v4183_v16, %v917_v13  ;;  %v1054_v8 = vadd.f32 %v1046_v23, %v1022_v4  ;;  %v1173_v1 = vmul.f32 %v4242_v40, %v1062_v28  ;;  %v4847_v23 = vld [vmem:[#allocation4_spill] sm:$0xff] }
 0x12c   : > { %v938_v42 = vmax.f32 %v930_v44, 0.0  ;;  %v931_v11 = vadd.f32 %v4183_v16, %v915_v17  ;;  %v1117_v57 = vadd.f32 %v1109_v9, %v1085_v45  ;;  %v983_v0 = vmul.f32 %v4195_v54, %v1062_v28  ;;  %v4318_v16 = vld [vmem:[%s4833_s5 + $0x8] ss:$0 sm:$0xff]  ;;  %v1128_v44 = vld [vmem:[#allocation2 + $0x69] sm:$0xff]  ;;  %v4848_v17 = vld [vmem:[#allocation5_spill] sm:$0xff] }
 0x12d   : > { %v948_v56 = vmin.f32 %v940_v26, 6.0  ;;  %v941_v51 = vmax.f32 %v933_v62, 0.0  ;;  %v1086_v34 = vadd.f32 %v1078_v46, %v1054_v8  ;;  %v1047_v3 = vmul.f32 %v4212_v60, %v1126_v20 }
 0x12e   : > { %v946_v30 = vmin.f32 %v938_v42, 6.0  ;;  %v939_v50 = vmax.f32 %v931_v11, 0.0  ;;  %v1149_v6 = vadd.f32 %v1141_v53, %v1117_v57  ;;  %v1023_v9 = vadd.f32 %v1015_v12, %v983_v0  ;;  %v4352_v11 = vld [vmem:[%s4834_s6 + $0x1] ss:$0 sm:$0xff] }
 0x12f   : > { %v4313_v37 = vadd.f32 %v948_v56, %v3982_v38  ;;  %v949_v33 = vmin.f32 %v941_v51, 6.0  ;;  %v1118_v58 = vadd.f32 %v1110_v24, %v1086_v34  ;;  %v1056_v53 = vadd.f32 %v1048_v43, %v1024_v55  ;;  %v4340_v55 = vld [vmem:[%s4834_s6] ss:$0 sm:$0xff] }
 0x130   : > { %v4321_v21 = vadd.f32 %v946_v30, %v4847_v23  ;;  %v947_v28 = vmin.f32 %v939_v50, 6.0  ;;  %v1181_v13 = vadd.f32 %v1173_v1, %v1149_v6  ;;  %v1055_v4 = vadd.f32 %v1047_v3, %v1023_v9 }
 0x131   : > { %964 = vst [vmem:[#allocation2 + $0xb0] sm:$0xff] %v4313_v37  ;;  %v4325_v63 = vadd.f32 %v949_v33, %v3985_v39  ;;  %v1150_v38 = vadd.f32 %v1142_v48, %v1118_v58  ;;  %v1080_v24 = vmul.f32 %v4253_v2, %v1064_v14  ;;  %v1237_v45 = vmul.f32 %v4318_v16, %v1126_v20 }
 0x132   : > { %962 = vst [vmem:[#allocation2 + $0x80] sm:$0xff] %v4321_v21  ;;  %v4330_v12 = vadd.f32 %v947_v28, %v4848_v17  ;;  %v1213_v46 = vadd.f32 %v1205_v10, %v1181_v13  ;;  %v1238_v43 = vmul.f32 %v4318_v16, %v4270_v61  ;;  %v1087_v26 = vadd.f32 %v1079_v15, %v1055_v4 }
 0x133   : > { %965 = vst [vmem:[#allocation2 + $0xc8] sm:$0xff] %v4325_v63  ;;  %v1182_v39 = vadd.f32 %v4285_v52, %v1150_v38  ;;  %v1088_v62 = vadd.f32 %v1080_v24, %v1056_v53  ;;  %v1143_v8 = vmul.f32 %v4268_v32, %v4270_v61  ;;  %v1144_v20 = vmul.f32 %v4268_v32, %v1128_v44 }
 0x134   : > { %963 = vst [vmem:[#allocation2 + $0x98] sm:$0xff] %v4330_v12  ;;  %v1245_v10 = vadd.f32 %v1237_v45, %v1213_v46  ;;  %v1175_v48 = vmul.f32 %v4242_v40, %v1064_v14  ;;  %v985_v42 = vmul.f32 %v4195_v54, %v1064_v14  ;;  %v1119_v15 = vadd.f32 %v4261_v22, %v1087_v26 }
 0x135   : > { %v1214_v52 = vadd.f32 %v4246_v59, %v1182_v39  ;;  %v1120_v61 = vadd.f32 %v4274_v31, %v1088_v62  ;;  %v1208_v57 = vmul.f32 %v4231_v5, %v4321_v21  ;;  %v1239_v56 = vmul.f32 %v4318_v16, %v1128_v44 }
 0x136   : > { %v1260_v1 = vmul.f32 %v4340_v55, %v1245_v10  ;;  %v1025_v51 = vadd.f32 %v4282_v19, %v985_v42  ;;  %v1049_v59 = vmul.f32 %v4212_v60, %v1128_v44  ;;  %v1151_v0 = vadd.f32 %v1143_v8, %v1119_v15 }
 0x137   : > { %v1246_v34 = vadd.f32 %v1238_v43, %v1214_v52  ;;  %v1018_v30 = vmul.f32 %v4201_v18, %v4321_v21  ;;  %v1113_v22 = vmul.f32 %v4237_v29, %v4321_v21  ;;  %v1152_v50 = vadd.f32 %v1144_v20, %v1120_v61 }
 0x138   : > { %v1276_v31 = vadd.f32 %v4352_v11, %v1260_v1  ;;  %v1057_v6 = vadd.f32 %v1049_v59, %v1025_v51  ;;  %v1114_v3 = vmul.f32 %v4237_v29, %v4330_v12  ;;  %v1183_v33 = vadd.f32 %v1175_v48, %v1151_v0  ;;  %v1162_v9 = vld [vmem:[#allocation2 + $0xaf] sm:$0xff] }
 0x139   : > { %v1261_v14 = vmul.f32 %v4340_v55, %v1246_v34  ;;  %v1160_v19 = vld [vmem:[#allocation2 + $0x7f] sm:$0xff]  ;;  %v1209_v23 = vmul.f32 %v4231_v5, %v4330_v12  ;;  %v4374_v28 = vmul.f32 %v4231_v5, %v4313_v37  ;;  %v1178_v4 = vmul.f32 %v4242_v40, %v1162_v9 }
 0x13a   : > { %v1224_v58 = vld [vmem:[#allocation2 + $0x81] sm:$0xff]  ;;  %v1284_v13 = vmax.f32 %v1276_v31, 0.0  ;;  %v1176_v53 = vmul.f32 %v4242_v40, %v1160_v19  ;;  %v986_v38 = vmul.f32 %v4195_v54, %v1160_v19  ;;  %v1215_v44 = vadd.f32 %v4278_v41, %v1183_v33  ;;  %v1226_v31 = vld [vmem:[#allocation2 + $0xb1] sm:$0xff] }
 0x13b   : > { %v1277_v24 = vadd.f32 %v4352_v11, %v1261_v14  ;;  %v1050_v17 = vmul.f32 %v4212_v60, %v1224_v58  ;;  %v1066_v46 = vld [vmem:[#allocation2 + $0x97] sm:$0xff]  ;;  %v1081_v45 = vmul.f32 %v4253_v2, %v1160_v19  ;;  %v1240_v26 = vmul.f32 %v4318_v16, %v1224_v58 }
 0x13c   : > { %v1130_v43 = vld [vmem:[#allocation2 + $0x99] sm:$0xff]  ;;  %v1184_v39 = vadd.f32 %v1176_v53, %v1152_v50  ;;  %v1026_v62 = vadd.f32 %v1018_v30, %v986_v38  ;;  %v1082_v8 = vmul.f32 %v4253_v2, %v1066_v46  ;;  %v1247_v20 = vadd.f32 %v1239_v56, %v1215_v44  ;;  %v1068_v53 = vld [vmem:[#allocation2 + $0xc7] sm:$0xff] }
 0x13d   : > { %v1285_v10 = vmax.f32 %v1277_v24, 0.0  ;;  %v1089_v48 = vadd.f32 %v1081_v45, %v1057_v6  ;;  %v1145_v42 = vmul.f32 %v4268_v32, %v1224_v58  ;;  %v1292_v52 = vmin.f32 %v1284_v13, 6.0 }
 0x13e   : > { %v1216_v15 = vadd.f32 %v1208_v57, %v1184_v39  ;;  %v1058_v41 = vadd.f32 %v1050_v17, %v1026_v62  ;;  %v1146_v61 = vmul.f32 %v4268_v32, %v1130_v43  ;;  %v1262_v51 = vmul.f32 %v4340_v55, %v1247_v20 }
 0x13f   : > { %v1293_v1 = vmin.f32 %v1285_v10, 6.0  ;;  %v1121_v59 = vadd.f32 %v1113_v22, %v1089_v48  ;;  %v1177_v34 = vmul.f32 %v4242_v40, %v1066_v46  ;;  %v987_v50 = vmul.f32 %v4195_v54, %v1066_v46 }
 0x140   : > { %v1248_v0 = vadd.f32 %v1240_v26, %v1216_v15  ;;  %v1090_v30 = vadd.f32 %v1082_v8, %v1058_v41  ;;  %v988_v56 = vmul.f32 %v4195_v54, %v1162_v9  ;;  %v1278_v14 = vadd.f32 %v4352_v11, %v1262_v51  ;;  %v1132_v41 = vld [vmem:[#allocation2 + $0xc9] sm:$0xff] }
 0x141   : > { %v1300_v6 = vpack.c.bf16 %v1293_v1, %v1292_v52  ;;  %v1153_v57 = vadd.f32 %v1145_v42, %v1121_v59  ;;  %v1019_v19 = vmul.f32 %v4201_v18, %v4330_v12  ;;  %v1020_v22 = vmul.f32 %v4201_v18, %v4313_v37 }
 0x142   : > { %v1263_v33 = vmul.f32 %v4340_v55, %v1248_v0  ;;  %v1122_v58 = vadd.f32 %v1114_v3, %v1090_v30  ;;  %v1051_v13 = vmul.f32 %v4212_v60, %v1130_v43  ;;  %v1286_v38 = vmax.f32 %v1278_v14, 0.0  ;;  %v4420_v14 = vld [vmem:[#allocation2] sm:$0xff] }
 0x143   : > { %3373 = vmatprep.mubr.bf16.mxu1 %v1300_v6  ;;  %v1185_v24 = vadd.f32 %v1177_v34, %v1153_v57  ;;  %v1027_v54 = vadd.f32 %v1019_v19, %v987_v50  ;;  %v1052_v44 = vmul.f32 %v4212_v60, %v1226_v31  ;;  %v1241_v45 = vmul.f32 %v4318_v16, %v1130_v43 }
 0x144   : > { %v1279_v17 = vadd.f32 %v4352_v11, %v1263_v33  ;;  %v1154_v46 = vadd.f32 %v1146_v61, %v1122_v58  ;;  %v1028_v39 = vadd.f32 %v1020_v22, %v988_v56  ;;  %v1083_v62 = vmul.f32 %v4253_v2, %v1162_v9  ;;  %v3706_v22 = vld [vmem:[%s4837_s9 + $0x50] sm:$0xff]  }
 0x145   : > { %v1217_v26 = vadd.f32 %v1209_v23, %v1185_v24  ;;  %v1059_v3 = vadd.f32 %v1051_v13, %v1027_v54  ;;  %v1084_v18 = vmul.f32 %v4253_v2, %v1068_v53  ;;  %v1294_v10 = vmin.f32 %v1286_v38, 6.0 }
 0x146   : > { %v1287_v8 = vmax.f32 %v1279_v17, 0.0  ;;  %v1186_v20 = vadd.f32 %v1178_v4, %v1154_v46  ;;  %v1060_v48 = vadd.f32 %v1052_v44, %v1028_v39  ;;  %v1242_v42 = vmul.f32 %v4318_v16, %v1226_v31 }
 0x147   : > { %v1249_v52 = vadd.f32 %v1241_v45, %v1217_v26  ;;  %v1091_v60 = vadd.f32 %v1083_v62, %v1059_v3  ;;  %v1115_v15 = vmul.f32 %v4237_v29, %v4313_v37  ;;  %v1116_v9 = vmul.f32 %v4237_v29, %v4325_v63 }
 0x148   : > { %v1295_v43 = vmin.f32 %v1287_v8, 6.0  ;;  %v1218_v23 = vadd.f32 %v4374_v28, %v1186_v20  ;;  %v1092_v61 = vadd.f32 %v1084_v18, %v1060_v48  ;;  %v1147_v4 = vmul.f32 %v4268_v32, %v1226_v31  ;;  %v3704_v28 = vld [vmem:[%s4837_s9 + $0x48] sm:$0xff]   ;;  %v3707_v8 = vld [vmem:[%s4837_s9 + $0xd0] sm:$0xff]   ;;  %v3711_v48 = vld [vmem:[%s4837_s9 + $0xe0] sm:$0xff]  }
 0x149   : > { %v1264_v2 = vmul.f32 %v4340_v55, %v1249_v52  ;;  %v1123_v1 = vadd.f32 %v1115_v15, %v1091_v60  ;;  %v1180_v51 = vmul.f32 %v4242_v40, %v4112_v47  ;;  %v1148_v30 = vmul.f32 %v4268_v32, %v1132_v41  ;;  %3457 = vmatprep.subr.bf16.mxu0 %v3707_v8  ;;  %v3712_v20 = vld [vmem:[%s4837_s9 + $0x68] sm:$0xff]   ;;  %v3716_v60 = vld [vmem:[%s4837_s9 + $0x78] sm:$0xff]   ;;  %v3715_v15 = vld [vmem:[%s4837_s9 + $0xf0] sm:$0xff]  }
 0x14a   : > { %v1301_v59 = vpack.c.bf16 %v1295_v43, %v1294_v10  ;;  %v1250_v34 = vadd.f32 %v1242_v42, %v1218_v23  ;;  %v1124_v0 = vadd.f32 %v1116_v9, %v1092_v61  ;;  %v1179_v56 = vmul.f32 %v4242_v40, %v1068_v53  ;;  %3458 = vmatpush3.bf16.msra.mxu0 %v3707_v8  ;;  %v3710_v10 = vld [vmem:[%s4837_s9 + $0x60] sm:$0xff]   ;;  %v3714_v42 = vld [vmem:[%s4837_s9 + $0x70] sm:$0xff]   ;;  %v3713_v52 = vld [vmem:[%s4837_s9 + $0xe8] sm:$0xff]  }
 0x14b   : > { %v1280_v50 = vadd.f32 %v4352_v11, %v1264_v2  ;;  %v1155_v29 = vadd.f32 %v1147_v4, %v1123_v1  ;;  %v1212_v47 = vmul.f32 %v4420_v14, %v4231_v5  ;;  %v1211_v32 = vmul.f32 %v4231_v5, %v4325_v63  ;;  %v3717_v43 = vld [vmem:[%s4837_s9 + $0xf8] sm:$0xff]   ;;  %v4477_v23 = vld [vmem:[%s4837_s9 + $0x100] sm:$0xff]  }
 0x14c   : > { %3374 = vmatmul.mubr.bf16.vlgmr.msra.gmra.mrb[8].mxu1 %v1301_v59  ;;  %v1265_v31 = vmul.f32 %v4340_v55, %v1250_v34  ;;  %v1156_v6 = vadd.f32 %v1148_v30, %v1124_v0  ;;  %v1244_v40 = vmul.f32 %v4318_v16, %v4125_v25  ;;  %v1243_v53 = vmul.f32 %v4318_v16, %v1132_v41  ;;  %v3718_v41 = vld [vmem:[%s4837_s9] sm:$0xff]  }
 0x14d   : > { %v1187_v57 = vadd.f32 %v1179_v56, %v1155_v29  ;;  %3382 = vmatpush3.bf16.msra.mxu1 %v4166_v49  ;;  %v1288_v33 = vmax.f32 %v1280_v50, 0.0  ;;  %v2991_v61 = vld [vmem:[%s4836_s8] ss:$0 sm:$0xff]  ;;  %v2993_v2 = vld [vmem:[%s4836_s8 + $0x1] ss:$0 sm:$0xff] }
 0x14e   : > { %v1281_v19 = vadd.f32 %v4352_v11, %v1265_v31  ;;  %v1188_v58 = vadd.f32 %v1180_v51, %v1156_v6  ;;  %3383 = vmatprep.subr.bf16.mxu1 %v3704_v28 }
 0x14f   : > { %v1219_v13 = vadd.f32 %v1211_v32, %v1187_v57  ;;  %v1296_v49 = vmin.f32 %v1288_v33, 6.0 }
 0x150   : > { %v1289_v38 = vmax.f32 %v1281_v19, 0.0  ;;  %v1220_v24 = vadd.f32 %v1212_v47, %v1188_v58 }
 0x151   : > { %v1251_v5 = vadd.f32 %v1243_v53, %v1219_v13  ;;  %3384 = vmatpush3.bf16.msra.mxu1 %v3704_v28 }
 0x152   : > { %v1297_v54 = vmin.f32 %v1289_v38, 6.0  ;;  %v1252_v44 = vadd.f32 %v1244_v40, %v1220_v24  ;;  %3385 = vmatprep.subr.bf16.mxu1 %v3706_v22 }
 0x153   : > { %v1266_v17 = vmul.f32 %v4340_v55, %v1251_v5  ;;  %v3722_v5 = vld [vmem:[%s4837_s9 + $0x10] sm:$0xff]  }
 0x154   : > { %v1302_v46 = vpack.c.bf16 %v1297_v54, %v1296_v49  ;;  %v1267_v25 = vmul.f32 %v4340_v55, %v1252_v44  ;;  %v3708_v55 = vld [vmem:[%s4837_s9 + $0x58] sm:$0xff]  }
 0x155   : > { %v1282_v45 = vadd.f32 %v4352_v11, %v1266_v17  ;;  %3386 = vmatpush3.bf16.msra.mxu1 %v3706_v22 }
 0x156   : > { %3377 = vmatprep.mubr.bf16.mxu1 %v1302_v46  ;;  %v1283_v39 = vadd.f32 %v4352_v11, %v1267_v25  ;;  %v3709_v11 = vld [vmem:[%s4837_s9 + $0xd8] sm:$0xff]   ;;  %3387 = vmatprep.subr.bf16.mxu1 %v3708_v55 }
 0x157   : > { %v1290_v16 = vmax.f32 %v1282_v45, 0.0  ;;  %3459 = vmatprep.subr.bf16.mxu0 %v3709_v11 }
 0x158   : > { %v1291_v26 = vmax.f32 %v1283_v39, 0.0  ;;  %3460 = vmatpush3.bf16.msra.mxu0 %v3709_v11 }
 0x159   : > { %v1298_v3 = vmin.f32 %v1290_v16, 6.0  ;;  %3388 = vmatpush3.bf16.msra.mxu1 %v3708_v55  ;;  %3461 = vmatprep.subr.bf16.mxu0 %v3711_v48  ;;  %v3724_v55 = vld [vmem:[%s4837_s9 + $0x18] sm:$0xff]  }
 0x15a   : > { %v1299_v62 = vmin.f32 %v1291_v26, 6.0  ;;  %3389 = vmatprep.subr.bf16.mxu1 %v3710_v10 }
 0x15c   : > { %v1303_v18 = vpack.c.bf16 %v1299_v62, %v1298_v3  ;;  %3462 = vmatpush3.bf16.msra.mxu0 %v3711_v48  ;;  %v3721_v48 = vld [vmem:[%s4837_s9 + $0x108] sm:$0xff]  }
 0x15d   : > { %3390 = vmatpush3.bf16.msra.mxu1 %v3710_v10  ;;  %3463 = vmatprep.subr.bf16.mxu0 %v3713_v52 }
 0x15e   : > { %3378 = vmatmul.mubr.bf16.gmra.mrb[12].mxu1 %v1303_v18  ;;  %3391 = vmatprep.subr.bf16.mxu1 %v3712_v20 }
 0x160   : > { %3464 = vmatpush3.bf16.msra.mxu0 %v3713_v52 }
 0x161   : > { %3392 = vmatpush3.bf16.msra.mxu1 %v3712_v20  ;;  %3465 = vmatprep.subr.bf16.mxu0 %v3715_v15 }
 0x162   : > { %3393 = vmatprep.subr.bf16.mxu1 %v3714_v42 }
 0x164   : > { %3466 = vmatpush3.bf16.msra.mxu0 %v3715_v15 }
 0x165   : > { %3394 = vmatpush3.bf16.msra.mxu1 %v3714_v42  ;;  %3467 = vmatprep.subr.bf16.mxu0 %v3717_v43 }
 0x166   : > { %3395 = vmatprep.subr.bf16.mxu1 %v3716_v60 }
 0x168   : > { %3468 = vmatpush3.bf16.msra.mxu0 %v3717_v43 }
 0x169   : > { %3396 = vmatpush3.bf16.msra.mxu1 %v3716_v60  ;;  %3477 = vmatprep.subr.bf16.mxu0 %v4477_v23 }
 0x16a   : > { %3405 = vmatprep.subr.bf16.mxu1 %v3718_v41 }
 0x21f   : > { %v3375_v9 = vpop.f32.mrb[8].mxu1 }
 0x220   : > { %v1442_v1 = vmul.f32 %v3375_v9, %v2991_v61  ;;  %v1402_v4 = vpop.f32.mrb[9].mxu1 }
 0x221   : > { %v1440_v51 = vmul.f32 %v2991_v61, %v1402_v4  ;;  %v3376_v59 = vpop.f32.mrb[10].mxu1 }
 0x222   : > { %v1458_v34 = vadd.f32 %v2993_v2, %v1442_v1  ;;  %v1443_v0 = vmul.f32 %v3376_v59, %v2991_v61  ;;  %v1405_v30 = vpop.f32.mrb[11].mxu1 }
 0x223   : > { %v1456_v28 = vadd.f32 %v2993_v2, %v1440_v51  ;;  %v1441_v50 = vmul.f32 %v2991_v61, %v1405_v30 }
 0x224   : > { %v1466_v29 = vmax.f32 %v1458_v34, 0.0  ;;  %v1459_v56 = vadd.f32 %v2993_v2, %v1443_v0  ;;  %v1496_v34 = vld [vmem:[#allocation2 + $0x7] sm:$0xff] }
 0x225   : > { %v1464_v31 = vmax.f32 %v1456_v28, 0.0  ;;  %v1457_v6 = vadd.f32 %v2993_v2, %v1441_v50  ;;  %v3728_v0 = vld [vmem:[%s4837_s9 + $0x28] sm:$0xff]   ;;  %v3730_v50 = vld [vmem:[%s4837_s9 + $0x30] sm:$0xff]  }
 0x226   : > { %v1474_v47 = vmin.f32 %v1466_v29, 6.0  ;;  %v1467_v57 = vmax.f32 %v1459_v56, 0.0  ;;  %v3727_v29 = vld [vmem:[%s4837_s9 + $0x120] sm:$0xff]  }
 0x227   : > { %v1472_v32 = vmin.f32 %v1464_v31, 6.0  ;;  %v1465_v19 = vmax.f32 %v1457_v6, 0.0 }
 0x228   : > { %v4487_v33 = vadd.f32 %v1474_v47, %v4207_v35  ;;  %v1475_v58 = vmin.f32 %v1467_v57, 6.0  ;;  %v3729_v47 = vld [vmem:[%s4837_s9 + $0x128] sm:$0xff]  }
 0x229   : > { %v4490_v40 = vadd.f32 %v1472_v32, %v4215_v36  ;;  %v1473_v22 = vmin.f32 %v1465_v19, 6.0  ;;  %v3732_v19 = vld [vmem:[%s4837_s9 + $0x38] sm:$0xff]  }
 0x22a   : > { %1490 = vst [vmem:[#allocation2 + $0x50] sm:$0xff] %v4487_v33  ;;  %v4494_v13 = vadd.f32 %v1475_v58, %v4219_v27  ;;  %v3720_v27 = vld [vmem:[%s4837_s9 + $0x8] sm:$0xff]  }
 0x22b   : > { %1488 = vst [vmem:[#allocation2 + $0x20] sm:$0xff] %v4490_v40  ;;  %v4498_v53 = vadd.f32 %v1473_v22, %v4223_v7  ;;  %v1532_v38 = vpack.c.bf16 %v4490_v40, %v4420_v14  ;;  %v3734_v22 = vld [vmem:[%s4837_s9 + $0x80] sm:$0xff]  }
 0x22c   : > { %1491 = vst [vmem:[#allocation2 + $0x68] sm:$0xff] %v4494_v13  ;;  %v2088_v35 = vpack.c.bf16 %v4494_v13, %v4487_v33 }
 0x22d   : > { %1489 = vst [vmem:[#allocation2 + $0x38] sm:$0xff] %v4498_v53  ;;  %3397 = vmatprep.mubr.bf16.mxu1 %v1532_v38  ;;  %v4508_v36 = vpack.c.bf16 %v4487_v33, %v4498_v53  ;;  %v2087_v7 = vpack.c.bf16 %v4498_v53, %v4490_v40  ;;  %v3731_v38 = vld [vmem:[%s4837_s9 + $0x130] sm:$0xff]   ;;  %v3741_v33 = vld [vmem:[%s4837_s9 + $0x158] sm:$0xff]  }
 0x22e   : > { %v3738_v53 = vld [vmem:[%s4837_s9 + $0x90] sm:$0xff]  }
 0x22f   : > { %3398 = vmatmul.mubr.bf16.vlgmr.msra.gmra.mrb[16].mxu1 %v4508_v36 }
 0x230   : > { %3406 = vmatpush3.bf16.msra.mxu1 %v3718_v41 }
 0x231   : > { %v3379_v24 = vpop.f32.mrb[12].mxu1  ;;  %3407 = vmatprep.subr.bf16.mxu1 %v3720_v27  ;;  %v4524_v8 = vld [vmem:[#allocation2 + $0x4f] sm:$0xff] }
 0x232   : > { %v1446_v49 = vmul.f32 %v3379_v24, %v2991_v61  ;;  %v1418_v54 = vpop.f32.mrb[13].mxu1  ;;  %v1929_v16 = vld [vmem:[#allocation2 + $0x1f] sm:$0xff]  ;;  %v3736_v24 = vld [vmem:[%s4837_s9 + $0x88] sm:$0xff]  }
 0x233   : > { %v1444_v44 = vmul.f32 %v2991_v61, %v1418_v54  ;;  %v3380_v17 = vpop.f32.mrb[14].mxu1  ;;  %v4519_v46 = vld [vmem:[#allocation2 + $0x67] sm:$0xff]  ;;  %v1504_v28 = vpack.c.bf16 %v1929_v16, %v1496_v34  ;;  %v3755_v34 = vld [vmem:[%s4837_s9 + $0x190] sm:$0xff]  }
 0x234   : > { %v1462_v25 = vadd.f32 %v2993_v2, %v1446_v49  ;;  %v1447_v45 = vmul.f32 %v3380_v17, %v2991_v61  ;;  %v1421_v39 = vpop.f32.mrb[15].mxu1  ;;  %v4521_v26 = vld [vmem:[#allocation2 + $0x37] sm:$0xff]  ;;  %3408 = vmatpush3.bf16.msra.mxu1 %v3720_v27  ;;  %v1938_v20 = vpack.c.bf16 %v4519_v46, %v4524_v8  ;;  %v1779_v54 = vld [vmem:[#allocation2 + $0x9] sm:$0xff] }
 0x235   : > { %v1460_v3 = vadd.f32 %v2993_v2, %v1444_v44  ;;  %v1445_v62 = vmul.f32 %v2991_v61, %v1421_v39  ;;  %v1937_v18 = vpack.c.bf16 %v4521_v26, %v1929_v16  ;;  %3409 = vmatprep.subr.bf16.mxu1 %v3722_v5  ;;  %v3726_v61 = vld [vmem:[%s4837_s9 + $0x20] sm:$0xff]   ;;  %v4603_v27 = vpack.c.bf16 %v4524_v8, %v4521_v26  ;;  %v3737_v17 = vld [vmem:[%s4837_s9 + $0x148] sm:$0xff]   ;;  %v3739_v39 = vld [vmem:[%s4837_s9 + $0x150] sm:$0xff]  }
 0x236   : > { %v1470_v11 = vmax.f32 %v1462_v25, 0.0  ;;  %v1463_v10 = vadd.f32 %v2993_v2, %v1447_v45  ;;  %v1780_v44 = vld [vmem:[#allocation2 + $0x21] sm:$0xff]  ;;  %v2230_v16 = vld [vmem:[#allocation2 + $0x39] sm:$0xff]  ;;  %v3746_v26 = vld [vmem:[%s4837_s9 + $0xb0] sm:$0xff]  }
 0x237   : > { %v1468_v42 = vmax.f32 %v1460_v3, 0.0  ;;  %v1461_v52 = vadd.f32 %v2993_v2, %v1445_v62  ;;  %3469 = vmatprep.mubr.bf16.mxu0 %v1937_v18  ;;  %v3723_v2 = vld [vmem:[%s4837_s9 + $0x110] sm:$0xff]   ;;  %v1787_v25 = vpack.c.bf16 %v1780_v44, %v1779_v54  ;;  %v3742_v45 = vld [vmem:[%s4837_s9 + $0xa0] sm:$0xff]   ;;  %v3748_v62 = vld [vmem:[%s4837_s9 + $0xb8] sm:$0xff]  }
 0x238   : > { %v1478_v60 = vmin.f32 %v1470_v11, 6.0  ;;  %v1471_v15 = vmax.f32 %v1463_v10, 0.0  ;;  %3470 = vmatmul.mubr.bf16.vlgmr.msra.gmra.mrb[0].mxu0 %v1938_v20  ;;  %3410 = vmatpush3.bf16.msra.mxu1 %v3722_v5  ;;  %v3733_v5 = vld [vmem:[%s4837_s9 + $0x138] sm:$0xff]   ;;  %v3743_v3 = vld [vmem:[%s4837_s9 + $0x160] sm:$0xff]   ;;  %v3745_v18 = vld [vmem:[%s4837_s9 + $0x168] sm:$0xff]  }
 0x239   : > { %v1476_v41 = vmin.f32 %v1468_v42, 6.0  ;;  %v1469_v43 = vmax.f32 %v1461_v52, 0.0  ;;  %3478 = vmatpush3.bf16.msra.mxu0 %v4477_v23  ;;  %3411 = vmatprep.subr.bf16.mxu1 %v3724_v55  ;;  %v4664_v8 = vld [vmem:[%s4837_s9 + $0x200] sm:$0xff]   ;;  %v1782_v10 = vld [vmem:[#allocation2 + $0x51] sm:$0xff]  ;;  %v4675_v42 = vld [vmem:[%s4837_s9 + $0x208] sm:$0xff]  }
 0x23a   : > { %v4539_v9 = vadd.f32 %v1478_v60, %v4313_v37  ;;  %v1479_v1 = vmin.f32 %v1471_v15, 6.0  ;;  %3479 = vmatprep.subr.bf16.mxu0 %v3721_v48  ;;  %v4669_v20 = vpack.c.bf16 %v1782_v10, %v2230_v16  ;;  %v3749_v52 = vld [vmem:[%s4837_s9 + $0x178] sm:$0xff]   ;;  %v4689_v15 = vld [vmem:[%s4837_s9 + $0x210] sm:$0xff]  }
 0x23b   : > { %v4545_v4 = vadd.f32 %v1476_v41, %v4321_v21  ;;  %v1477_v51 = vmin.f32 %v1469_v43, 6.0  ;;  %v3725_v21 = vld [vmem:[%s4837_s9 + $0x118] sm:$0xff]   ;;  %v3751_v41 = vld [vmem:[%s4837_s9 + $0x180] sm:$0xff]  }
 0x23c   : > { %1494 = vst [vmem:[#allocation2 + $0xb0] sm:$0xff] %v4539_v9  ;;  %v4549_v23 = vadd.f32 %v1479_v1, %v4325_v63  ;;  %3412 = vmatpush3.bf16.msra.mxu1 %v3724_v55  ;;  %v3747_v55 = vld [vmem:[%s4837_s9 + $0x170] sm:$0xff]  }
 0x23d   : > { %1492 = vst [vmem:[#allocation2 + $0x80] sm:$0xff] %v4545_v4  ;;  %v4553_v37 = vadd.f32 %v1477_v51, %v4330_v12  ;;  %3480 = vmatpush3.bf16.msra.mxu0 %v3721_v48  ;;  %v4557_v59 = vpack.c.bf16 %v4545_v4, %v4494_v13  ;;  %3413 = vmatprep.subr.bf16.mxu1 %v3726_v61  ;;  %v3744_v13 = vld [vmem:[%s4837_s9 + $0xa8] sm:$0xff]   ;;  %v4702_v51 = vld [vmem:[%s4837_s9 + $0x218] sm:$0xff]  }
 0x23e   : > { %1495 = vst [vmem:[#allocation2 + $0xc8] sm:$0xff] %v4549_v23  ;;  %3481 = vmatprep.subr.bf16.mxu0 %v3723_v2  ;;  %v2090_v63 = vpack.c.bf16 %v4549_v23, %v4539_v9  ;;  %v1783_v48 = vld [vmem:[#allocation2 + $0x69] sm:$0xff] }
 0x23f   : > { %1493 = vst [vmem:[#allocation2 + $0x98] sm:$0xff] %v4553_v37  ;;  %3401 = vmatprep.mubr.bf16.mxu1 %v4557_v59  ;;  %v4569_v12 = vpack.c.bf16 %v4539_v9, %v4553_v37  ;;  %v2089_v30 = vpack.c.bf16 %v4553_v37, %v4545_v4  ;;  %v2238_v1 = vpack.c.bf16 %v1783_v48, %v1782_v10  ;;  %v4708_v37 = vld [vmem:[%s4837_s9 + $0x220] sm:$0xff]  }
 0x240   : > { %3414 = vmatpush3.bf16.msra.mxu1 %v3726_v61 }
 0x241   : > { %3402 = vmatmul.mubr.bf16.gmra.mrb[20].mxu1 %v4569_v12  ;;  %3482 = vmatpush3.bf16.msra.mxu0 %v3723_v2  ;;  %v3753_v2 = vld [vmem:[%s4837_s9 + $0x188] sm:$0xff]  }
 0x242   : > { %3421 = vmatprep.mubr.bf16.mxu1 %v1504_v28  ;;  %3483 = vmatprep.subr.bf16.mxu0 %v3725_v21  ;;  %v4729_v28 = vld [vmem:[%s4837_s9 + $0x230] sm:$0xff]  }
 0x243   : > { %3415 = vmatprep.subr.bf16.mxu1 %v3728_v0  ;;  %v1935_v32 = vld [vmem:[#allocation2 + $0xaf] sm:$0xff] }
 0x244   : > { %3416 = vmatpush3.bf16.msra.mxu1 %v3728_v0  ;;  %v1933_v31 = vld [vmem:[#allocation2 + $0x7f] sm:$0xff]  ;;  %v1786_v61 = vld [vmem:[#allocation2 + $0xb1] sm:$0xff] }
 0x245   : > { %v4583_v56 = vld [vmem:[#allocation2 + $0xc7] sm:$0xff]  ;;  %3484 = vmatpush3.bf16.msra.mxu0 %v3725_v21  ;;  %3417 = vmatprep.subr.bf16.mxu1 %v3730_v50  ;;  %v4612_v40 = vpack.c.bf16 %v1933_v31, %v4519_v46  ;;  %v3740_v46 = vld [vmem:[%s4837_s9 + $0x98] sm:$0xff]  }
 0x246   : > { %v1934_v6 = vld [vmem:[#allocation2 + $0x97] sm:$0xff]  ;;  %3485 = vmatprep.subr.bf16.mxu0 %v3727_v29  ;;  %v1940_v58 = vpack.c.bf16 %v4583_v56, %v1935_v32  ;;  %v1784_v11 = vld [vmem:[#allocation2 + $0x81] sm:$0xff]  ;;  %v2236_v21 = vld [vmem:[#allocation2 + $0xc9] sm:$0xff] }
 0x247   : > { %v1939_v57 = vpack.c.bf16 %v1934_v6, %v1933_v31  ;;  %v4622_v49 = vpack.c.bf16 %v1935_v32, %v1934_v6  ;;  %v4680_v60 = vpack.c.bf16 %v1784_v11, %v1783_v48  ;;  %v2234_v43 = vld [vmem:[#allocation2 + $0x99] sm:$0xff]  ;;  %v3761_v31 = vld [vmem:[%s4837_s9 + $0x1a8] sm:$0xff]   ;;  %v3763_v6 = vld [vmem:[%s4837_s9 + $0x1b0] sm:$0xff]  }
 0x248   : > { %3418 = vmatpush3.bf16.msra.mxu1 %v3730_v50  ;;  %v1790_v9 = vpack.c.bf16 %v1786_v61, %v2234_v43  ;;  %v2239_v4 = vpack.c.bf16 %v2234_v43, %v1784_v11  ;;  %v3757_v0 = vld [vmem:[%s4837_s9 + $0x198] sm:$0xff]   ;;  %v3759_v50 = vld [vmem:[%s4837_s9 + $0x1a0] sm:$0xff]  }
 0x249   : > { %3473 = vmatprep.mubr.bf16.mxu0 %v1939_v57  ;;  %3486 = vmatpush3.bf16.msra.mxu0 %v3727_v29  ;;  %v4740_v29 = vld [vmem:[%s4837_s9 + $0x238] sm:$0xff]  }
 0x24a   : > { %3474 = vmatmul.mubr.bf16.gmra.mrb[4].mxu0 %v1940_v58  ;;  %3487 = vmatprep.subr.bf16.mxu0 %v3729_v47  ;;  %v3765_v32 = vld [vmem:[%s4837_s9 + $0x1b8] sm:$0xff]   ;;  %v3767_v58 = vld [vmem:[%s4837_s9 + $0x1c8] sm:$0xff]  }
 0x24b   : > { %3493 = vmatprep.mubr.bf16.mxu0 %v2087_v7  ;;  %3419 = vmatprep.subr.bf16.mxu1 %v3732_v19  ;;  %v3735_v7 = vld [vmem:[%s4837_s9 + $0x140] sm:$0xff]  }
 0x24c   : > { %3420 = vmatpush3.bf16.msra.mxu1 %v3732_v19  ;;  %v3766_v19 = vld [vmem:[%s4837_s9 + $0x1c0] sm:$0xff]  }
 0x24d   : > { %3488 = vmatpush3.bf16.msra.mxu0 %v3729_v47  ;;  %3429 = vmatprep.subr.bf16.mxu1 %v3734_v22  ;;  %v2686_v47 = vld [vmem:[#allocation2 + $0xe1] sm:$0xff] }
 0x24e   : > { %3489 = vmatprep.subr.bf16.mxu0 %v3731_v38  ;;  %v2690_v57 = vpack.c.bf16 %v2686_v47, %v2236_v21 }
 0x24f   : > { %3422 = vmatmul.mubr.bf16.vlgmr.msra.gmra.mrb[16].mxu1 %v4603_v27 }
 0x250   : > { %3425 = vmatprep.mubr.bf16.mxu1 %v4612_v40  ;;  %3430 = vmatpush3.bf16.msra.mxu1 %v3734_v22  ;;  %v3768_v22 = vld [vmem:[%s4837_s9 + $0x1d0] sm:$0xff]  }
 0x251   : > { %3490 = vmatpush3.bf16.msra.mxu0 %v3731_v38  ;;  %3431 = vmatprep.subr.bf16.mxu1 %v3736_v24  ;;  %v2386_v38 = vld [vmem:[#allocation2 + $0xdf] sm:$0xff] }
 0x252   : > { %3491 = vmatprep.subr.bf16.mxu0 %v3733_v5 }
 0x254   : > { %3432 = vmatpush3.bf16.msra.mxu1 %v3736_v24  ;;  %v3769_v24 = vld [vmem:[%s4837_s9 + $0x1d8] sm:$0xff]  }
 0x255   : > { %3492 = vmatpush3.bf16.msra.mxu0 %v3733_v5  ;;  %3433 = vmatprep.subr.bf16.mxu1 %v3738_v53  ;;  %v3770_v5 = vld [vmem:[%s4837_s9 + $0x1e0] sm:$0xff]  }
 0x256   : > { %3501 = vmatprep.subr.bf16.mxu0 %v3735_v7 }
 0x257   : > { %3426 = vmatmul.mubr.bf16.gmra.mrb[20].mxu1 %v4622_v49 }
 0x258   : > { %3494 = vmatmul.mubr.bf16.vlgmr.msra.gmra.mrb[0].mxu0 %v2088_v35  ;;  %3434 = vmatpush3.bf16.msra.mxu1 %v3738_v53  ;;  %v2237_v35 = vpack.c.bf16 %v2230_v16, %v1780_v44  ;;  %v2540_v53 = vpack.c.bf16 %v4420_v14, %v4549_v23 }
 0x259   : > { %3497 = vmatprep.mubr.bf16.mxu0 %v2089_v30  ;;  %3502 = vmatpush3.bf16.msra.mxu0 %v3735_v7  ;;  %v4722_v30 = vld [vmem:[%s4837_s9 + $0x228] sm:$0xff]  }
 0x25a   : > { %3503 = vmatprep.subr.bf16.mxu0 %v3737_v17  ;;  %3445 = vmatprep.mubr.bf16.mxu1 %v1787_v25 }
 0x25b   : > { %3435 = vmatprep.subr.bf16.mxu1 %v3740_v46 }
 0x25c   : > { %3436 = vmatpush3.bf16.msra.mxu1 %v3740_v46 }
 0x25d   : > { %3504 = vmatpush3.bf16.msra.mxu0 %v3737_v17  ;;  %3437 = vmatprep.subr.bf16.mxu1 %v3742_v45 }
 0x25e   : > { %3505 = vmatprep.subr.bf16.mxu0 %v3739_v39 }
 0x260   : > { %3498 = vmatmul.mubr.bf16.gmra.mrb[4].mxu0 %v2090_v63  ;;  %3438 = vmatpush3.bf16.msra.mxu1 %v3742_v45  ;;  %v2240_v63 = vpack.c.bf16 %v2236_v21, %v1786_v61 }
 0x261   : > { %3506 = vmatpush3.bf16.msra.mxu0 %v3739_v39  ;;  %3517 = vmatprep.mubr.bf16.mxu0 %v2237_v35 }
 0x262   : > { %3507 = vmatprep.subr.bf16.mxu0 %v3741_v33  ;;  %3439 = vmatprep.subr.bf16.mxu1 %v3744_v13 }
 0x264   : > { %3440 = vmatpush3.bf16.msra.mxu1 %v3744_v13  ;;  %v3194_v13 = vld [vmem:[%s4838_s10] ss:$0 sm:$0xff] }
 0x265   : > { %3508 = vmatpush3.bf16.msra.mxu0 %v3741_v33  ;;  %3441 = vmatprep.subr.bf16.mxu1 %v3746_v26 }
 0x266   : > { %3509 = vmatprep.subr.bf16.mxu0 %v3743_v3 }
 0x268   : > { %3442 = vmatpush3.bf16.msra.mxu1 %v3746_v26 }
 0x269   : > { %3510 = vmatpush3.bf16.msra.mxu0 %v3743_v3  ;;  %3443 = vmatprep.subr.bf16.mxu1 %v3748_v62 }
 0x26a   : > { %3511 = vmatprep.subr.bf16.mxu0 %v3745_v18 }
 0x26c   : > { %3444 = vmatpush3.bf16.msra.mxu1 %v3748_v62 }
 0x26d   : > { %3512 = vmatpush3.bf16.msra.mxu0 %v3745_v18  ;;  %3597 = vmatprep.subr.bf16.mxu1 %v4664_v8 }
 0x26e   : > { %3513 = vmatprep.subr.bf16.mxu0 %v3747_v55 }
 0x26f   : > { %3446 = vmatmul.mubr.bf16.vlgmr.msra.gmra.mrb[16].mxu1 %v4669_v20 }
 0x270   : > { %3449 = vmatprep.mubr.bf16.mxu1 %v4680_v60  ;;  %3605 = vmatpush3.bf16.msra.mxu1 %v4664_v8 }
 0x271   : > { %3514 = vmatpush3.bf16.msra.mxu0 %v3747_v55  ;;  %3598 = vmatprep.subr.bf16.mxu1 %v4675_v42 }
 0x272   : > { %3515 = vmatprep.subr.bf16.mxu0 %v3749_v52 }
 0x274   : > { %3606 = vmatpush3.bf16.msra.mxu1 %v4675_v42 }
 0x275   : > { %3516 = vmatpush3.bf16.msra.mxu0 %v3749_v52  ;;  %3599 = vmatprep.subr.bf16.mxu1 %v4689_v15 }
 0x276   : > { %3525 = vmatprep.subr.bf16.mxu0 %v3751_v41 }
 0x277   : > { %3450 = vmatmul.mubr.bf16.gmra.mrb[20].mxu1 %v1790_v9 }
 0x278   : > { %3518 = vmatmul.mubr.bf16.vlgmr.msra.gmra.mrb[0].mxu0 %v2238_v1  ;;  %3607 = vmatpush3.bf16.msra.mxu1 %v4689_v15 }
 0x279   : > { %3521 = vmatprep.mubr.bf16.mxu0 %v2239_v4  ;;  %3526 = vmatpush3.bf16.msra.mxu0 %v3751_v41 }
 0x27a   : > { %3527 = vmatprep.subr.bf16.mxu0 %v3753_v2  ;;  %3593 = vmatprep.mubr.bf16.mxu1 %v1790_v9 }
 0x27b   : > { %3600 = vmatprep.subr.bf16.mxu1 %v4702_v51 }
 0x27c   : > { %3608 = vmatpush3.bf16.msra.mxu1 %v4702_v51 }
 0x27d   : > { %3528 = vmatpush3.bf16.msra.mxu0 %v3753_v2  ;;  %3601 = vmatprep.subr.bf16.mxu1 %v4708_v37 }
 0x27e   : > { %3529 = vmatprep.subr.bf16.mxu0 %v3755_v34 }
 0x280   : > { %3522 = vmatmul.mubr.bf16.gmra.mrb[4].mxu0 %v2240_v63  ;;  %3609 = vmatpush3.bf16.msra.mxu1 %v4708_v37 }
 0x281   : > { %3530 = vmatpush3.bf16.msra.mxu0 %v3755_v34  ;;  %3541 = vmatprep.mubr.bf16.mxu0 %v4603_v27  ;;  %v2390_v27 = vpack.c.bf16 %v2386_v38, %v4583_v56  ;;  %v3771_v56 = vld [vmem:[%s4837_s9 + $0x1e8] sm:$0xff]  }
 0x282   : > { %3531 = vmatprep.subr.bf16.mxu0 %v3757_v0  ;;  %3602 = vmatprep.subr.bf16.mxu1 %v4722_v30 }
 0x284   : > { %3610 = vmatpush3.bf16.msra.mxu1 %v4722_v30 }
 0x285   : > { %3532 = vmatpush3.bf16.msra.mxu0 %v3757_v0  ;;  %3603 = vmatprep.subr.bf16.mxu1 %v4729_v28 }
 0x286   : > { %3533 = vmatprep.subr.bf16.mxu0 %v3759_v50 }
 0x288   : > { %3611 = vmatpush3.bf16.msra.mxu1 %v4729_v28 }
 0x289   : > { %3534 = vmatpush3.bf16.msra.mxu0 %v3759_v50  ;;  %3604 = vmatprep.subr.bf16.mxu1 %v4740_v29 }
 0x28a   : > { %3535 = vmatprep.subr.bf16.mxu0 %v3761_v31 }
 0x28c   : > { %3612 = vmatpush3.bf16.msra.mxu1 %v4740_v29 }
 0x28d   : > { %3536 = vmatpush3.bf16.msra.mxu0 %v3761_v31 }
 0x28e   : > { %3537 = vmatprep.subr.bf16.mxu0 %v3763_v6 }
 0x28f   : > { %3594 = vmatmul.mubr.bf16.vlgmr.msra.gmra.mrb[24].mxu1 %v2690_v57 }
 0x291   : > { %3538 = vmatpush3.bf16.msra.mxu0 %v3763_v6 }
 0x292   : > { %3539 = vmatprep.subr.bf16.mxu0 %v3765_v32 }
 0x295   : > { %3540 = vmatpush3.bf16.msra.mxu0 %v3765_v32 }
 0x296   : > { %3549 = vmatprep.subr.bf16.mxu0 %v3766_v19 }
 0x298   : > { %3542 = vmatmul.mubr.bf16.vlgmr.msra.gmra.mrb[0].mxu0 %v4612_v40  ;;  %v3772_v40 = vld [vmem:[%s4837_s9 + $0x1f0] sm:$0xff]  }
 0x299   : > { %3545 = vmatprep.mubr.bf16.mxu0 %v4622_v49  ;;  %3550 = vmatpush3.bf16.msra.mxu0 %v3766_v19 }
 0x29a   : > { %3551 = vmatprep.subr.bf16.mxu0 %v3767_v58 }
 0x29d   : > { %3552 = vmatpush3.bf16.msra.mxu0 %v3767_v58 }
 0x29e   : > { %3553 = vmatprep.subr.bf16.mxu0 %v3768_v22 }
 0x2a0   : > { %3546 = vmatmul.mubr.bf16.gmra.mrb[4].mxu0 %v2390_v27 }
 0x2a1   : > { %3554 = vmatpush3.bf16.msra.mxu0 %v3768_v22  ;;  %3565 = vmatprep.mubr.bf16.mxu0 %v4508_v36  ;;  %v3773_v36 = vld [vmem:[%s4837_s9 + $0x1f8] sm:$0xff]  }
 0x2a2   : > { %3555 = vmatprep.subr.bf16.mxu0 %v3769_v24 }
 0x2a5   : > { %3556 = vmatpush3.bf16.msra.mxu0 %v3769_v24 }
 0x2a6   : > { %3557 = vmatprep.subr.bf16.mxu0 %v3770_v5 }
 0x2a9   : > { %3558 = vmatpush3.bf16.msra.mxu0 %v3770_v5 }
 0x2aa   : > { %3559 = vmatprep.subr.bf16.mxu0 %v3771_v56 }
 0x2ad   : > { %3560 = vmatpush3.bf16.msra.mxu0 %v3771_v56 }
 0x2ae   : > { %3561 = vmatprep.subr.bf16.mxu0 %v3772_v40 }
 0x2b1   : > { %3562 = vmatpush3.bf16.msra.mxu0 %v3772_v40 }
 0x2b2   : > { %3563 = vmatprep.subr.bf16.mxu0 %v3773_v36 }
 0x2b5   : > { %3564 = vmatpush3.bf16.msra.mxu0 %v3773_v36 }
 0x2b6   : > { %3573 = vmatprep.subr.bf16.mxu0 %v4664_v8 }
 0x2b8   : > { %3566 = vmatmul.mubr.bf16.vlgmr.msra.gmra.mrb[0].mxu0 %v4557_v59 }
 0x2b9   : > { %3569 = vmatprep.mubr.bf16.mxu0 %v4569_v12  ;;  %3574 = vmatpush3.bf16.msra.mxu0 %v4664_v8  ;;  %v3196_v8 = vld [vmem:[%s4838_s10 + $0x1] ss:$0 sm:$0xff] }
 0x2ba   : > { %3575 = vmatprep.subr.bf16.mxu0 %v4675_v42 }
 0x2bd   : > { %3576 = vmatpush3.bf16.msra.mxu0 %v4675_v42 }
 0x2be   : > { %3577 = vmatprep.subr.bf16.mxu0 %v4689_v15 }
 0x2c0   : > { %3570 = vmatmul.mubr.bf16.gmra.mrb[4].mxu0 %v2540_v53 }
 0x2c1   : > { %3578 = vmatpush3.bf16.msra.mxu0 %v4689_v15  ;;  %3589 = vmatprep.mubr.bf16.mxu0 %v4669_v20 }
 0x2c2   : > { %3579 = vmatprep.subr.bf16.mxu0 %v4702_v51 }
 0x2c5   : > { %3580 = vmatpush3.bf16.msra.mxu0 %v4702_v51 }
 0x2c6   : > { %3581 = vmatprep.subr.bf16.mxu0 %v4708_v37 }
 0x2c9   : > { %3582 = vmatpush3.bf16.msra.mxu0 %v4708_v37 }
 0x2ca   : > { %3583 = vmatprep.subr.bf16.mxu0 %v4722_v30 }
 0x2cd   : > { %3584 = vmatpush3.bf16.msra.mxu0 %v4722_v30 }
 0x2ce   : > { %3585 = vmatprep.subr.bf16.mxu0 %v4729_v28 }
 0x2d1   : > { %3586 = vmatpush3.bf16.msra.mxu0 %v4729_v28 }
 0x2d2   : > { %3587 = vmatprep.subr.bf16.mxu0 %v4740_v29 }
 0x2d5   : > { %3588 = vmatpush3.bf16.msra.mxu0 %v4740_v29 }
 0x2d8   : > { %3590 = vmatmul.mubr.bf16.vlgmr.msra.gmra.mrb[0].mxu0 %v4680_v60 }
 0x342   : > { %v3447_v14 = vpop.f32.mrb[16].mxu1 }
 0x343   : > { %v1890_v23 = vpop.f32.mrb[17].mxu1 }
 0x344   : > { %v3448_v59 = vpop.f32.mrb[18].mxu1 }
 0x345   : > { %v1893_v12 = vpop.f32.mrb[19].mxu1 }
 0x34a   : > { %v3451_v7 = vpop.f32.mrb[20].mxu1 }
 0x34b   : > { %v1906_v49 = vpop.f32.mrb[21].mxu1 }
 0x34c   : > { %v3452_v54 = vpop.f32.mrb[22].mxu1 }
 0x34d   : > { %v1909_v44 = vpop.f32.mrb[23].mxu1 }
 0x362   : > { %v3595_v17 = vpop.f32.mrb[24].mxu1 }
 0x363   : > { %v2806_v46 = vpop.f32.mrb[25].mxu1 }
 0x364   : > { %v3596_v25 = vpop.f32.mrb[26].mxu1 }
 0x365   : > { %v2809_v45 = vpop.f32.mrb[27].mxu1 }
 0x393   : > { %v3571_v39 = vpop.f32.mrb[4].mxu0 }
 0x394   : > { %v3617_v16 = vadd.f32 %v3571_v39, %v3451_v7  ;;  %v2656_v33 = vpop.f32.mrb[5].mxu0 }
 0x395   : > { %v3619_v35 = vadd.f32 %v2656_v33, %v1906_v49  ;;  %v3572_v26 = vpop.f32.mrb[6].mxu0 }
 0x396   : > { %v3618_v3 = vadd.f32 %v3617_v16, %v3595_v17  ;;  %v3621_v62 = vadd.f32 %v3572_v26, %v3452_v54  ;;  %v2659_v18 = vpop.f32.mrb[7].mxu0 }
 0x397   : > { %v3620_v55 = vadd.f32 %v3619_v35, %v2806_v46  ;;  %v3623_v11 = vadd.f32 %v2659_v18, %v1909_v44 }
 0x398   : > { %v2842_v10 = vmul.f32 %v3618_v3, %v3194_v13  ;;  %v3622_v20 = vadd.f32 %v3621_v62, %v3596_v25 }
 0x399   : > { %v2840_v48 = vmul.f32 %v3620_v55, %v3194_v13  ;;  %v3624_v42 = vadd.f32 %v3623_v11, %v2809_v45 }
 0x39a   : > { %v2858_v52 = vadd.f32 %v3196_v8, %v2842_v10  ;;  %v2843_v60 = vmul.f32 %v3622_v20, %v3194_v13 }
 0x39b   : > { %v2856_v15 = vadd.f32 %v3196_v8, %v2840_v48  ;;  %v2841_v41 = vmul.f32 %v3624_v42, %v3194_v13 }
 0x39c   : > { %2866 = vst [vmem:[%s4815_s15 + $0x30] sm:$0xff] %v2858_v52  ;;  %v2859_v43 = vadd.f32 %v3196_v8, %v2843_v60 }
 0x39d   : > { %2864 = vst [vmem:[%s4815_s15 + $0x20] sm:$0xff] %v2856_v15  ;;  %v2857_v61 = vadd.f32 %v3196_v8, %v2841_v41 }
 0x39e   : > { %2867 = vst [vmem:[%s4815_s15 + $0x38] sm:$0xff] %v2859_v43 }
 0x39f   : > { %2865 = vst [vmem:[%s4815_s15 + $0x28] sm:$0xff] %v2857_v61 }
 0x3ab   : > { %v3591_v9 = vpop.f32.mrb[0].mxu0 }
 0x3ac   : > { %v3613_v1 = vadd.f32 %v3591_v9, %v3447_v14  ;;  %v2790_v2 = vpop.f32.mrb[1].mxu0 }
 0x3ad   : > { %v3614_v4 = vadd.f32 %v2790_v2, %v1890_v23  ;;  %v3592_v51 = vpop.f32.mrb[2].mxu0 }
 0x3ae   : > { %v2838_v37 = vmul.f32 %v3613_v1, %v3194_v13  ;;  %v3615_v34 = vadd.f32 %v3592_v51, %v3448_v59  ;;  %v2793_v21 = vpop.f32.mrb[3].mxu0 }
 0x3af   : > { %v2836_v63 = vmul.f32 %v3614_v4, %v3194_v13  ;;  %v3616_v0 = vadd.f32 %v2793_v21, %v1893_v12 }
 0x3b0   : > { %v2854_v30 = vadd.f32 %v3196_v8, %v2838_v37  ;;  %v2839_v28 = vmul.f32 %v3615_v34, %v3194_v13 }
 0x3b1   : > { %v2852_v50 = vadd.f32 %v3196_v8, %v2836_v63  ;;  %v2837_v29 = vmul.f32 %v3616_v0, %v3194_v13 }
 0x3b2   : > { %2862 = vst [vmem:[%s4815_s15 + $0x10] sm:$0xff] %v2854_v30  ;;  %v2855_v31 = vadd.f32 %v3196_v8, %v2839_v28 }
 0x3b3   : > { %2860 = vst [vmem:[%s4815_s15] sm:$0xff] %v2852_v50  ;;  %v2853_v6 = vadd.f32 %v3196_v8, %v2837_v29 }
 0x3b4   : > { %2863 = vst [vmem:[%s4815_s15 + $0x18] sm:$0xff] %v2855_v31 }
 0x3b5   : > { %2861 = vst [vmem:[%s4815_s15 + $0x8] sm:$0xff] %v2853_v6 }
 0x3b6 PF: > { %s21_s17 = sadd.s32 1, %s3781_s17  }
 0x3b7   : > { %p18_p4 = scmp.ge.s32.totalorder %s21_s17, 4  }
 0x3b9   :  { %20 = sbr.rel (!%p18_p4) target bundleno = 1 (0x1), region = 125 }

</bundles_post_ra>
